<compile_context>
chip_gen: v6e
topology: v6e:2x2x1
jax: 0.10.0
libtpu: 0.0.40
codegen_flags: <defaults>
</compile_context>

<pallas_src>
import jax
import jax.numpy as jnp
from jax.experimental import pallas as pl
from jax.experimental.pallas import tpu as pltpu  # noqa: F401  (TPU backend)


# ----------------------- configuration (small shapes) -----------------------
BATCH = 2
LATENT_DIM = 32
SEQ_LEN = 16
EMBED_DIM = 16
NUM_HEADS = 4          # head_dim = 4
DEPTH = 2
CHANNELS = 3
FF_EXPANSION = 4
LN_EPS = 1e-5          # torch.nn.LayerNorm default

HEAD_DIM = EMBED_DIM // NUM_HEADS
BS = BATCH * SEQ_LEN           # 32  folded (batch, seq) rows
HBS = NUM_HEADS * BS           # 128 folded (head, batch, seq) lanes
SE = SEQ_LEN * EMBED_DIM       # 256 l1 output width


# ------------------------- slab layout (static offsets) ----------------------
def _round_up(n, m):
    return ((n + m - 1) // m) * m


def _build_layout():
    entries = [
        ("sel",         (BS, BATCH)),            # one-hot row replication (32, 2)
        ("l1_bias_pos", (BS, EMBED_DIM)),        # l1 bias + pos embed, pre-tiled
        ("mask_bias",   (BS, HBS)),              # batch block-diag attn mask (0 / -1e30)
        ("head_mask",   (HBS, EMBED_DIM)),       # head block-diag 0/1 mask
        ("ones_block",  (HBS, HBS)),             # per-head-block row-sum matrix
        ("conv_wt",     (EMBED_DIM, CHANNELS)),  # conv weight, transposed (16, 3)
        ("conv_b",      (1, CHANNELS)),
    ]
    for d in range(DEPTH):
        entries += [
            (f"blk{d}_bias", (16, 128)),         # all LN params + biases, one row each
            (f"blk{d}_wq", (EMBED_DIM, EMBED_DIM)),
            (f"blk{d}_wk", (EMBED_DIM, EMBED_DIM)),
            (f"blk{d}_wv", (EMBED_DIM, EMBED_DIM)),
            (f"blk{d}_wp", (EMBED_DIM, EMBED_DIM)),
            (f"blk{d}_w1", (EMBED_DIM, FF_EXPANSION * EMBED_DIM)),
            (f"blk{d}_w2", (FF_EXPANSION * EMBED_DIM, EMBED_DIM)),
        ]
    layout, row = {}, 0
    for name, (r, c) in entries:
        layout[name] = (row, r, c)
        row += _round_up(r, 8)
    return layout, row


_SLAB_LAYOUT, _SLAB_ROWS = _build_layout()

# rows inside each per-block bias tile
_B_LN1G, _B_LN1B, _B_LN2G, _B_LN2B = 0, 1, 2, 3
_B_BQ, _B_BK, _B_BV, _B_BP = 4, 5, 6, 7
_B_B1, _B_B2 = 8, 9

# 256-wide l1 slab layout: l1 weight, lane-selection mask, fold matrix (transposed)
_L1W_OFF = 0
_LSEL_OFF = LATENT_DIM
_FOLDT_OFF = LATENT_DIM + BS
_L1PACK_ROWS = LATENT_DIM + BS + EMBED_DIM     # 80


# ------------------------------ kernel helpers -------------------------------
def _layer_norm(x, gamma, beta):
    mu = jnp.mean(x, axis=-1, keepdims=True)
    var = jnp.mean((x - mu) ** 2, axis=-1, keepdims=True)
    return (x - mu) * jax.lax.rsqrt(var + LN_EPS) * gamma + beta


def _gelu_exact(x):
    # exact GELU (erf), matching torch.nn.GELU default
    return 0.5 * x * (1.0 + jax.lax.erf(x * 0.7071067811865476))


# --------------------------------- kernel ------------------------------------
def generator_kernel(z_ref, l1pack_ref, slab_ref, out_ref):
    E, H = EMBED_DIM, NUM_HEADS
    inv_scale = 1.0 / (E ** 0.5)     # softmax(energy / sqrt(emb_size)), per spec

    def slab(name):
        off, r, c = _SLAB_LAYOUT[name]
        return slab_ref[off:off + r, 0:c]

    def bias_row(d, i, c):
        off = _SLAB_LAYOUT[f"blk{d}_bias"][0]
        return slab_ref[off + i:off + i + 1, 0:c]

    # ---- l1: x[b*S+s, e] = (z[b] @ W)[s*E+e] + (bias + pos), via plain matmuls ----
    sel = slab("sel")                                                        # (32, 2)
    z_rep = jnp.dot(sel, z_ref[...], preferred_element_type=jnp.float32)     # (32, 32)
    l1_w = l1pack_ref[_L1W_OFF:_L1W_OFF + LATENT_DIM, :]                     # (32, 256)
    r_rep = jnp.dot(z_rep, l1_w, preferred_element_type=jnp.float32)         # (32, 256)
    lane_sel = l1pack_ref[_LSEL_OFF:_LSEL_OFF + BS, :]                       # (32, 256)
    foldt = l1pack_ref[_FOLDT_OFF:_FOLDT_OFF + E, :]                         # (16, 256)
    x = jax.lax.dot_general(r_rep * lane_sel, foldt,
                            (((1,), (1,)), ((), ())),
                            preferred_element_type=jnp.float32)              # (32, 16)
    x = x + slab("l1_bias_pos")

    mask_bias = slab("mask_bias")    # (32, 128)
    head_mask = slab("head_mask")    # (128, 16)
    ones_blk = slab("ones_block")    # (128, 128)

    # ---- transformer encoder blocks (static unroll) ------------------------------
    for d in range(DEPTH):
        wq, wk, wv = slab(f"blk{d}_wq"), slab(f"blk{d}_wk"), slab(f"blk{d}_wv")
        wp = slab(f"blk{d}_wp")
        w1, w2 = slab(f"blk{d}_w1"), slab(f"blk{d}_w2")

        # -------- sublayer 1: LayerNorm -> MHA (heads folded on lanes) -> residual
        xn = _layer_norm(x, bias_row(d, _B_LN1G, E), bias_row(d, _B_LN1B, E))
        q = jnp.dot(xn, wq, preferred_element_type=jnp.float32) + bias_row(d, _B_BQ, E)
        k = jnp.dot(xn, wk, preferred_element_type=jnp.float32) + bias_row(d, _B_BK, E)
        v = jnp.dot(xn, wv, preferred_element_type=jnp.float32) + bias_row(d, _B_BV, E)
        # block-diagonal (over heads) expansions: row h*BS+j carries head h only
        k_bd = jnp.concatenate([k] * H, axis=0) * head_mask                  # (128, 16)
        v_bd = jnp.concatenate([v] * H, axis=0) * head_mask                  # (128, 16)
        # all-head energies in one matmul; cross-batch entries masked out
        energy = jax.lax.dot_general(q, k_bd, (((1,), (1,)), ((), ())),
                                     preferred_element_type=jnp.float32)     # (32, 128)
        energy = energy * inv_scale + mask_bias
        m = jnp.max(energy, axis=-1, keepdims=True)
        p = jnp.exp(energy - m)
        # per-head-block softmax denominator via a single MXU push
        denom = jnp.dot(p, ones_blk, preferred_element_type=jnp.float32)     # (32, 128)
        att = p * pl.reciprocal(denom, approx=False)
        o = jnp.dot(att, v_bd, preferred_element_type=jnp.float32)           # (32, 16) heads concat
        x = x + jnp.dot(o, wp, preferred_element_type=jnp.float32) + bias_row(d, _B_BP, E)

        # -------- sublayer 2: LayerNorm -> FFN -> residual -------------------------
        xn2 = _layer_norm(x, bias_row(d, _B_LN2G, E), bias_row(d, _B_LN2B, E))
        h1 = jnp.dot(xn2, w1, preferred_element_type=jnp.float32) + bias_row(d, _B_B1, FF_EXPANSION * E)
        h1 = _gelu_exact(h1)
        h2 = jnp.dot(h1, w2, preferred_element_type=jnp.float32) + bias_row(d, _B_B2, E)
        x = x + h2

    # ---- deconv: 1x1 Conv2d as a single matmul, single (B*S, C) store ------------
    out_ref[...] = jnp.dot(x, slab("conv_wt"),
                           preferred_element_type=jnp.float32) + slab("conv_b")


# ------------------------------- wrapper --------------------------------------
def tts_gan_generator_forward(z, params):
    out_flat = pl.pallas_call(
        generator_kernel,
        out_shape=jax.ShapeDtypeStruct((BS, CHANNELS), jnp.float32),
    )(z, params["l1pack"], params["slab"])
    # (B*S, C) -> (B, S, C) -> (B, C, S) -> (B, C, 1, S): tiny metadata/layout ops.
    return out_flat.reshape(BATCH, SEQ_LEN, CHANNELS).transpose(0, 2, 1) \
                   .reshape(BATCH, CHANNELS, 1, SEQ_LEN)


# ------------------------- deterministic parameters ----------------------------
def init_params(key):
    S, E, C, L, FE = SEQ_LEN, EMBED_DIM, CHANNELS, LATENT_DIM, FF_EXPANSION
    H, D = NUM_HEADS, HEAD_DIM
    keys = iter(jax.random.split(key, 128))

    def w(shape, scale=0.02):
        return (scale * jax.random.normal(next(keys), shape)).astype(jnp.float32)

    # --- raw parameters (x @ W orientation; l1_w == torch weight.T, conv_w == torch w[:,:,0,0]) ---
    l1_w = w((L, S * E))
    l1_b = w((S * E,), 0.01)
    pos = w((1, S, E))
    conv_w = w((C, E))
    conv_b = w((C,), 0.01)

    blocks = []
    for _ in range(DEPTH):
        blocks.append(dict(
            ln1_g=(1.0 + w((1, E))).astype(jnp.float32), ln1_b=w((1, E)),
            wq=w((E, E)), bq=w((1, E), 0.01),
            wk=w((E, E)), bk=w((1, E), 0.01),
            wv=w((E, E)), bv=w((1, E), 0.01),
            wp=w((E, E)), bp=w((1, E), 0.01),
            ln2_g=(1.0 + w((1, E))).astype(jnp.float32), ln2_b=w((1, E)),
            w1=w((E, FE * E)), b1=w((1, FE * E), 0.01),
            w2=w((FE * E, E)), b2=w((1, E), 0.01),
        ))

    # --- host-precomputed constants (all indexing of folded row r = b*S + s) ---
    r32 = jnp.arange(BS)
    j128 = jnp.arange(HBS)                    # folded col c = h*BS + (b'*S + s')
    j256 = jnp.arange(S * E)
    sel = (r32[:, None] // S == jnp.arange(BATCH)[None, :]).astype(jnp.float32)            # (32, 2)
    l1_bias_pos = jnp.tile(l1_b.reshape(S, E) + pos[0], (BATCH, 1)).astype(jnp.float32)    # (32, 16)
    mask_bias = jnp.where((r32[:, None] // S) == ((j128[None, :] % BS) // S),
                          0.0, -1e30).astype(jnp.float32)                                  # (32, 128)
    head_mask = ((j128[:, None] // BS) == (jnp.arange(E)[None, :] // D)).astype(jnp.float32)   # (128, 16)
    ones_block = ((j128[:, None] // BS) == (j128[None, :] // BS)).astype(jnp.float32)      # (128, 128)
    lane_sel = ((j256[None, :] // E) == (r32[:, None] % S)).astype(jnp.float32)            # (32, 256)
    foldt = (jnp.arange(E)[:, None] == (j256[None, :] % E)).astype(jnp.float32)            # (16, 256)

    # --- pack the 256-wide l1 slab ---
    l1pack = jnp.zeros((_L1PACK_ROWS, S * E), jnp.float32)
    l1pack = l1pack.at[_L1W_OFF:_L1W_OFF + L, :].set(l1_w)
    l1pack = l1pack.at[_LSEL_OFF:_LSEL_OFF + BS, :].set(lane_sel)
    l1pack = l1pack.at[_FOLDT_OFF:_FOLDT_OFF + E, :].set(foldt)

    # --- pack the 128-wide parameter slab ---
    tensors = {
        "sel": sel,
        "l1_bias_pos": l1_bias_pos,
        "mask_bias": mask_bias,
        "head_mask": head_mask,
        "ones_block": ones_block,
        "conv_wt": conv_w.T,
        "conv_b": conv_b.reshape(1, C),
    }
    for d, blk in enumerate(blocks):
        bias = jnp.zeros((16, 128), jnp.float32)
        bias = bias.at[_B_LN1G, :E].set(blk["ln1_g"][0])
        bias = bias.at[_B_LN1B, :E].set(blk["ln1_b"][0])
        bias = bias.at[_B_LN2G, :E].set(blk["ln2_g"][0])
        bias = bias.at[_B_LN2B, :E].set(blk["ln2_b"][0])
        bias = bias.at[_B_BQ, :E].set(blk["bq"][0])
        bias = bias.at[_B_BK, :E].set(blk["bk"][0])
        bias = bias.at[_B_BV, :E].set(blk["bv"][0])
        bias = bias.at[_B_BP, :E].set(blk["bp"][0])
        bias = bias.at[_B_B1, :FE * E].set(blk["b1"][0])
        bias = bias.at[_B_B2, :E].set(blk["b2"][0])
        tensors[f"blk{d}_bias"] = bias
        tensors[f"blk{d}_wq"] = blk["wq"]
        tensors[f"blk{d}_wk"] = blk["wk"]
        tensors[f"blk{d}_wv"] = blk["wv"]
        tensors[f"blk{d}_wp"] = blk["wp"]
        tensors[f"blk{d}_w1"] = blk["w1"]
        tensors[f"blk{d}_w2"] = blk["w2"]

    slab = jnp.zeros((_SLAB_ROWS, 128), jnp.float32)
    for name, arr in tensors.items():
        off, r, c = _SLAB_LAYOUT[name]
        assert arr.shape == (r, c), (name, arr.shape, (r, c))
        slab = slab.at[off:off + r, 0:c].set(arr.astype(jnp.float32))

    return {"l1pack": l1pack, "slab": slab}


# ---------------------------------- main ---------------------------------------
if __name__ == "__main__":
    key = jax.random.PRNGKey(0)
    pkey, zkey = jax.random.split(key)
    params = init_params(pkey)
    z = jax.random.normal(zkey, (BATCH, LATENT_DIM), dtype=jnp.float32)

    forward = jax.jit(tts_gan_generator_forward)
    out = jax.block_until_ready(forward(z, params))

    assert out.shape == (BATCH, CHANNELS, 1, SEQ_LEN), out.shape
    assert out.dtype == jnp.float32
    assert bool(jnp.all(jnp.isfinite(out)))
    print("KERNEL_OK")
</pallas_src>

<mosaic_0001>
module attributes {stable_mosaic.version = 11 : i64} {
  func.func @generator_kernel(%arg0: memref<2x32xf32, #tpu.memory_space<vmem>>, %arg1: memref<80x256xf32, #tpu.memory_space<vmem>>, %arg2: memref<696x128xf32, #tpu.memory_space<vmem>>, %arg3: memref<32x3xf32, #tpu.memory_space<vmem>>) attributes {dimension_semantics = [], scalar_prefetch = 0 : i64, scratch_operands = 0 : i64, tpu.core_type = #tpu.core_type<tc>} {
    %c0 = arith.constant 0 : index
    %c0_0 = arith.constant 0 : index
    %0 = vector.load %arg2[%c0, %c0_0] : memref<696x128xf32, #tpu.memory_space<vmem>>, vector<32x2xf32>
    %c0_1 = arith.constant 0 : index
    %c0_2 = arith.constant 0 : index
    %1 = vector.load %arg0[%c0_1, %c0_2] : memref<2x32xf32, #tpu.memory_space<vmem>>, vector<2x32xf32>
    %cst = arith.constant dense<0.000000e+00> : vector<32x32xf32>
    %2 = tpu.matmul %0, %1, %cst {dimension_numbers = #tpu.dot_dimension_numbers<[1], [0], [0], [1], [0, 0, 1, 1], [], []>} : vector<32x2xf32>, vector<2x32xf32>, vector<32x32xf32> -> vector<32x32xf32>
    %c0_3 = arith.constant 0 : index
    %c0_4 = arith.constant 0 : index
    %3 = vector.load %arg1[%c0_3, %c0_4] : memref<80x256xf32, #tpu.memory_space<vmem>>, vector<32x256xf32>
    %cst_5 = arith.constant dense<0.000000e+00> : vector<32x256xf32>
    %4 = tpu.matmul %2, %3, %cst_5 {dimension_numbers = #tpu.dot_dimension_numbers<[1], [0], [0], [1], [0, 0, 1, 1], [], []>} : vector<32x32xf32>, vector<32x256xf32>, vector<32x256xf32> -> vector<32x256xf32>
    %c32 = arith.constant 32 : index
    %c0_6 = arith.constant 0 : index
    %5 = vector.load %arg1[%c32, %c0_6] : memref<80x256xf32, #tpu.memory_space<vmem>>, vector<32x256xf32>
    %c64 = arith.constant 64 : index
    %c0_7 = arith.constant 0 : index
    %6 = vector.load %arg1[%c64, %c0_7] : memref<80x256xf32, #tpu.memory_space<vmem>>, vector<16x256xf32>
    %7 = arith.mulf %4, %5 : vector<32x256xf32>
    %cst_8 = arith.constant dense<0.000000e+00> : vector<32x16xf32>
    %8 = tpu.matmul %7, %6, %cst_8 {dimension_numbers = #tpu.dot_dimension_numbers<[1], [1], [0], [0], [0, 0, 1, 0], [], []>} : vector<32x256xf32>, vector<16x256xf32>, vector<32x16xf32> -> vector<32x16xf32>
    %c32_9 = arith.constant 32 : index
    %c0_10 = arith.constant 0 : index
    %9 = vector.load %arg2[%c32_9, %c0_10] : memref<696x128xf32, #tpu.memory_space<vmem>>, vector<32x16xf32>
    %10 = arith.addf %8, %9 : vector<32x16xf32>
    %c64_11 = arith.constant 64 : index
    %c0_12 = arith.constant 0 : index
    %11 = vector.load %arg2[%c64_11, %c0_12] : memref<696x128xf32, #tpu.memory_space<vmem>>, vector<32x128xf32>
    %c96 = arith.constant 96 : index
    %c0_13 = arith.constant 0 : index
    %12 = vector.load %arg2[%c96, %c0_13] : memref<696x128xf32, #tpu.memory_space<vmem>>, vector<128x16xf32>
    %c224 = arith.constant 224 : index
    %c0_14 = arith.constant 0 : index
    %13 = vector.load %arg2[%c224, %c0_14] : memref<696x128xf32, #tpu.memory_space<vmem>>, vector<128x128xf32>
    %c392 = arith.constant 392 : index
    %c0_15 = arith.constant 0 : index
    %14 = vector.load %arg2[%c392, %c0_15] : memref<696x128xf32, #tpu.memory_space<vmem>>, vector<16x16xf32>
    %c408 = arith.constant 408 : index
    %c0_16 = arith.constant 0 : index
    %15 = vector.load %arg2[%c408, %c0_16] : memref<696x128xf32, #tpu.memory_space<vmem>>, vector<16x16xf32>
    %c424 = arith.constant 424 : index
    %c0_17 = arith.constant 0 : index
    %16 = vector.load %arg2[%c424, %c0_17] : memref<696x128xf32, #tpu.memory_space<vmem>>, vector<16x16xf32>
    %c440 = arith.constant 440 : index
    %c0_18 = arith.constant 0 : index
    %17 = vector.load %arg2[%c440, %c0_18] : memref<696x128xf32, #tpu.memory_space<vmem>>, vector<16x16xf32>
    %c456 = arith.constant 456 : index
    %c0_19 = arith.constant 0 : index
    %18 = vector.load %arg2[%c456, %c0_19] : memref<696x128xf32, #tpu.memory_space<vmem>>, vector<16x64xf32>
    %c472 = arith.constant 472 : index
    %c0_20 = arith.constant 0 : index
    %19 = vector.load %arg2[%c472, %c0_20] : memref<696x128xf32, #tpu.memory_space<vmem>>, vector<64x16xf32>
    %c376 = arith.constant 376 : index
    %c0_21 = arith.constant 0 : index
    %20 = vector.load %arg2[%c376, %c0_21] : memref<696x128xf32, #tpu.memory_space<vmem>>, vector<1x16xf32>
    %c377 = arith.constant 377 : index
    %c0_22 = arith.constant 0 : index
    %21 = vector.load %arg2[%c377, %c0_22] : memref<696x128xf32, #tpu.memory_space<vmem>>, vector<1x16xf32>
    %cst_23 = arith.constant dense<0.000000e+00> : vector<32xf32>
    %22 = vector.multi_reduction <add>, %10, %cst_23 [1] : vector<32x16xf32> to vector<32xf32>
    %23 = vector.shape_cast %22 : vector<32xf32> to vector<32x1xf32>
    %cst_24 = arith.constant 1.600000e+01 : f32
    %24 = vector.broadcast %cst_24 : f32 to vector<32x1xf32>
    %25 = arith.divf %23, %24 : vector<32x1xf32>
    %26 = vector.broadcast %25 : vector<32x1xf32> to vector<32x16xf32>
    %27 = arith.subf %10, %26 : vector<32x16xf32>
    %28 = arith.mulf %27, %27 : vector<32x16xf32>
    %cst_25 = arith.constant dense<0.000000e+00> : vector<32xf32>
    %29 = vector.multi_reduction <add>, %28, %cst_25 [1] : vector<32x16xf32> to vector<32xf32>
    %30 = vector.shape_cast %29 : vector<32xf32> to vector<32x1xf32>
    %cst_26 = arith.constant 1.600000e+01 : f32
    %31 = vector.broadcast %cst_26 : f32 to vector<32x1xf32>
    %32 = arith.divf %30, %31 : vector<32x1xf32>
    %33 = vector.broadcast %25 : vector<32x1xf32> to vector<32x16xf32>
    %34 = arith.subf %10, %33 : vector<32x16xf32>
    %cst_27 = arith.constant 9.99999974E-6 : f32
    %35 = vector.broadcast %cst_27 : f32 to vector<32x1xf32>
    %36 = arith.addf %32, %35 : vector<32x1xf32>
    %37 = math.rsqrt %36 : vector<32x1xf32>
    %38 = vector.broadcast %37 : vector<32x1xf32> to vector<32x16xf32>
    %39 = arith.mulf %34, %38 : vector<32x16xf32>
    %40 = vector.broadcast %20 : vector<1x16xf32> to vector<32x16xf32>
    %41 = arith.mulf %39, %40 : vector<32x16xf32>
    %42 = vector.broadcast %21 : vector<1x16xf32> to vector<32x16xf32>
    %43 = arith.addf %41, %42 : vector<32x16xf32>
    %cst_28 = arith.constant dense<0.000000e+00> : vector<32x16xf32>
    %44 = tpu.matmul %43, %14, %cst_28 {dimension_numbers = #tpu.dot_dimension_numbers<[1], [0], [0], [1], [0, 0, 1, 1], [], []>} : vector<32x16xf32>, vector<16x16xf32>, vector<32x16xf32> -> vector<32x16xf32>
    %c380 = arith.constant 380 : index
    %c0_29 = arith.constant 0 : index
    %45 = vector.load %arg2[%c380, %c0_29] : memref<696x128xf32, #tpu.memory_space<vmem>>, vector<1x16xf32>
    %46 = vector.broadcast %45 : vector<1x16xf32> to vector<32x16xf32>
    %47 = arith.addf %44, %46 : vector<32x16xf32>
    %cst_30 = arith.constant dense<0.000000e+00> : vector<32x16xf32>
    %48 = tpu.matmul %43, %15, %cst_30 {dimension_numbers = #tpu.dot_dimension_numbers<[1], [0], [0], [1], [0, 0, 1, 1], [], []>} : vector<32x16xf32>, vector<16x16xf32>, vector<32x16xf32> -> vector<32x16xf32>
    %c381 = arith.constant 381 : index
    %c0_31 = arith.constant 0 : index
    %49 = vector.load %arg2[%c381, %c0_31] : memref<696x128xf32, #tpu.memory_space<vmem>>, vector<1x16xf32>
    %50 = vector.broadcast %49 : vector<1x16xf32> to vector<32x16xf32>
    %51 = arith.addf %48, %50 : vector<32x16xf32>
    %cst_32 = arith.constant dense<0.000000e+00> : vector<32x16xf32>
    %52 = tpu.matmul %43, %16, %cst_32 {dimension_numbers = #tpu.dot_dimension_numbers<[1], [0], [0], [1], [0, 0, 1, 1], [], []>} : vector<32x16xf32>, vector<16x16xf32>, vector<32x16xf32> -> vector<32x16xf32>
    %c382 = arith.constant 382 : index
    %c0_33 = arith.constant 0 : index
    %53 = vector.load %arg2[%c382, %c0_33] : memref<696x128xf32, #tpu.memory_space<vmem>>, vector<1x16xf32>
    %54 = vector.broadcast %53 : vector<1x16xf32> to vector<32x16xf32>
    %55 = arith.addf %52, %54 : vector<32x16xf32>
    %56 = tpu.concatenate %51, %51, %51, %51 in 0 : vector<32x16xf32>, vector<32x16xf32>, vector<32x16xf32>, vector<32x16xf32> -> vector<128x16xf32>
    %57 = arith.mulf %56, %12 : vector<128x16xf32>
    %58 = tpu.concatenate %55, %55, %55, %55 in 0 : vector<32x16xf32>, vector<32x16xf32>, vector<32x16xf32>, vector<32x16xf32> -> vector<128x16xf32>
    %59 = arith.mulf %58, %12 : vector<128x16xf32>
    %cst_34 = arith.constant dense<0.000000e+00> : vector<32x128xf32>
    %60 = tpu.matmul %47, %57, %cst_34 {dimension_numbers = #tpu.dot_dimension_numbers<[1], [1], [0], [0], [0, 0, 1, 0], [], []>} : vector<32x16xf32>, vector<128x16xf32>, vector<32x128xf32> -> vector<32x128xf32>
    %cst_35 = arith.constant 2.500000e-01 : f32
    %61 = vector.broadcast %cst_35 : f32 to vector<32x128xf32>
    %62 = arith.mulf %60, %61 : vector<32x128xf32>
    %63 = arith.addf %62, %11 : vector<32x128xf32>
    %cst_36 = arith.constant dense<0xFF800000> : vector<32xf32>
    %64 = vector.multi_reduction <maximumf>, %63, %cst_36 [1] : vector<32x128xf32> to vector<32xf32>
    %65 = vector.shape_cast %64 : vector<32xf32> to vector<32x1xf32>
    %66 = vector.broadcast %65 : vector<32x1xf32> to vector<32x128xf32>
    %67 = arith.subf %63, %66 : vector<32x128xf32>
    %68 = math.exp %67 : vector<32x128xf32>
    %cst_37 = arith.constant dense<0.000000e+00> : vector<32x128xf32>
    %69 = tpu.matmul %68, %13, %cst_37 {dimension_numbers = #tpu.dot_dimension_numbers<[1], [0], [0], [1], [0, 0, 1, 1], [], []>} : vector<32x128xf32>, vector<128x128xf32>, vector<32x128xf32> -> vector<32x128xf32>
    %70 = tpu.reciprocal %69 : vector<32x128xf32> -> vector<32x128xf32>
    %71 = arith.mulf %68, %70 : vector<32x128xf32>
    %cst_38 = arith.constant dense<0.000000e+00> : vector<32x16xf32>
    %72 = tpu.matmul %71, %59, %cst_38 {dimension_numbers = #tpu.dot_dimension_numbers<[1], [0], [0], [1], [0, 0, 1, 1], [], []>} : vector<32x128xf32>, vector<128x16xf32>, vector<32x16xf32> -> vector<32x16xf32>
    %cst_39 = arith.constant dense<0.000000e+00> : vector<32x16xf32>
    %73 = tpu.matmul %72, %17, %cst_39 {dimension_numbers = #tpu.dot_dimension_numbers<[1], [0], [0], [1], [0, 0, 1, 1], [], []>} : vector<32x16xf32>, vector<16x16xf32>, vector<32x16xf32> -> vector<32x16xf32>
    %74 = arith.addf %10, %73 : vector<32x16xf32>
    %c383 = arith.constant 383 : index
    %c0_40 = arith.constant 0 : index
    %75 = vector.load %arg2[%c383, %c0_40] : memref<696x128xf32, #tpu.memory_space<vmem>>, vector<1x16xf32>
    %76 = vector.broadcast %75 : vector<1x16xf32> to vector<32x16xf32>
    %77 = arith.addf %74, %76 : vector<32x16xf32>
    %c378 = arith.constant 378 : index
    %c0_41 = arith.constant 0 : index
    %78 = vector.load %arg2[%c378, %c0_41] : memref<696x128xf32, #tpu.memory_space<vmem>>, vector<1x16xf32>
    %c379 = arith.constant 379 : index
    %c0_42 = arith.constant 0 : index
    %79 = vector.load %arg2[%c379, %c0_42] : memref<696x128xf32, #tpu.memory_space<vmem>>, vector<1x16xf32>
    %cst_43 = arith.constant dense<0.000000e+00> : vector<32xf32>
    %80 = vector.multi_reduction <add>, %77, %cst_43 [1] : vector<32x16xf32> to vector<32xf32>
    %81 = vector.shape_cast %80 : vector<32xf32> to vector<32x1xf32>
    %cst_44 = arith.constant 1.600000e+01 : f32
    %82 = vector.broadcast %cst_44 : f32 to vector<32x1xf32>
    %83 = arith.divf %81, %82 : vector<32x1xf32>
    %84 = vector.broadcast %83 : vector<32x1xf32> to vector<32x16xf32>
    %85 = arith.subf %77, %84 : vector<32x16xf32>
    %86 = arith.mulf %85, %85 : vector<32x16xf32>
    %cst_45 = arith.constant dense<0.000000e+00> : vector<32xf32>
    %87 = vector.multi_reduction <add>, %86, %cst_45 [1] : vector<32x16xf32> to vector<32xf32>
    %88 = vector.shape_cast %87 : vector<32xf32> to vector<32x1xf32>
    %cst_46 = arith.constant 1.600000e+01 : f32
    %89 = vector.broadcast %cst_46 : f32 to vector<32x1xf32>
    %90 = arith.divf %88, %89 : vector<32x1xf32>
    %91 = vector.broadcast %83 : vector<32x1xf32> to vector<32x16xf32>
    %92 = arith.subf %77, %91 : vector<32x16xf32>
    %cst_47 = arith.constant 9.99999974E-6 : f32
    %93 = vector.broadcast %cst_47 : f32 to vector<32x1xf32>
    %94 = arith.addf %90, %93 : vector<32x1xf32>
    %95 = math.rsqrt %94 : vector<32x1xf32>
    %96 = vector.broadcast %95 : vector<32x1xf32> to vector<32x16xf32>
    %97 = arith.mulf %92, %96 : vector<32x16xf32>
    %98 = vector.broadcast %78 : vector<1x16xf32> to vector<32x16xf32>
    %99 = arith.mulf %97, %98 : vector<32x16xf32>
    %100 = vector.broadcast %79 : vector<1x16xf32> to vector<32x16xf32>
    %101 = arith.addf %99, %100 : vector<32x16xf32>
    %cst_48 = arith.constant dense<0.000000e+00> : vector<32x64xf32>
    %102 = tpu.matmul %101, %18, %cst_48 {dimension_numbers = #tpu.dot_dimension_numbers<[1], [0], [0], [1], [0, 0, 1, 1], [], []>} : vector<32x16xf32>, vector<16x64xf32>, vector<32x64xf32> -> vector<32x64xf32>
    %c384 = arith.constant 384 : index
    %c0_49 = arith.constant 0 : index
    %103 = vector.load %arg2[%c384, %c0_49] : memref<696x128xf32, #tpu.memory_space<vmem>>, vector<1x64xf32>
    %104 = vector.broadcast %103 : vector<1x64xf32> to vector<32x64xf32>
    %105 = arith.addf %102, %104 : vector<32x64xf32>
    %cst_50 = arith.constant 5.000000e-01 : f32
    %106 = vector.broadcast %cst_50 : f32 to vector<32x64xf32>
    %107 = arith.mulf %106, %105 : vector<32x64xf32>
    %cst_51 = arith.constant 0.707106769 : f32
    %108 = vector.broadcast %cst_51 : f32 to vector<32x64xf32>
    %109 = arith.mulf %105, %108 : vector<32x64xf32>
    %110 = math.erf %109 : vector<32x64xf32>
    %cst_52 = arith.constant 1.000000e+00 : f32
    %111 = vector.broadcast %cst_52 : f32 to vector<32x64xf32>
    %112 = arith.addf %111, %110 : vector<32x64xf32>
    %113 = arith.mulf %107, %112 : vector<32x64xf32>
    %cst_53 = arith.constant dense<0.000000e+00> : vector<32x16xf32>
    %114 = tpu.matmul %113, %19, %cst_53 {dimension_numbers = #tpu.dot_dimension_numbers<[1], [0], [0], [1], [0, 0, 1, 1], [], []>} : vector<32x64xf32>, vector<64x16xf32>, vector<32x16xf32> -> vector<32x16xf32>
    %c385 = arith.constant 385 : index
    %c0_54 = arith.constant 0 : index
    %115 = vector.load %arg2[%c385, %c0_54] : memref<696x128xf32, #tpu.memory_space<vmem>>, vector<1x16xf32>
    %116 = vector.broadcast %115 : vector<1x16xf32> to vector<32x16xf32>
    %117 = arith.addf %114, %116 : vector<32x16xf32>
    %118 = arith.addf %77, %117 : vector<32x16xf32>
    %c552 = arith.constant 552 : index
    %c0_55 = arith.constant 0 : index
    %119 = vector.load %arg2[%c552, %c0_55] : memref<696x128xf32, #tpu.memory_space<vmem>>, vector<16x16xf32>
    %c568 = arith.constant 568 : index
    %c0_56 = arith.constant 0 : index
    %120 = vector.load %arg2[%c568, %c0_56] : memref<696x128xf32, #tpu.memory_space<vmem>>, vector<16x16xf32>
    %c584 = arith.constant 584 : index
    %c0_57 = arith.constant 0 : index
    %121 = vector.load %arg2[%c584, %c0_57] : memref<696x128xf32, #tpu.memory_space<vmem>>, vector<16x16xf32>
    %c600 = arith.constant 600 : index
    %c0_58 = arith.constant 0 : index
    %122 = vector.load %arg2[%c600, %c0_58] : memref<696x128xf32, #tpu.memory_space<vmem>>, vector<16x16xf32>
    %c616 = arith.constant 616 : index
    %c0_59 = arith.constant 0 : index
    %123 = vector.load %arg2[%c616, %c0_59] : memref<696x128xf32, #tpu.memory_space<vmem>>, vector<16x64xf32>
    %c632 = arith.constant 632 : index
    %c0_60 = arith.constant 0 : index
    %124 = vector.load %arg2[%c632, %c0_60] : memref<696x128xf32, #tpu.memory_space<vmem>>, vector<64x16xf32>
    %c536 = arith.constant 536 : index
    %c0_61 = arith.constant 0 : index
    %125 = vector.load %arg2[%c536, %c0_61] : memref<696x128xf32, #tpu.memory_space<vmem>>, vector<1x16xf32>
    %c537 = arith.constant 537 : index
    %c0_62 = arith.constant 0 : index
    %126 = vector.load %arg2[%c537, %c0_62] : memref<696x128xf32, #tpu.memory_space<vmem>>, vector<1x16xf32>
    %cst_63 = arith.constant dense<0.000000e+00> : vector<32xf32>
    %127 = vector.multi_reduction <add>, %118, %cst_63 [1] : vector<32x16xf32> to vector<32xf32>
    %128 = vector.shape_cast %127 : vector<32xf32> to vector<32x1xf32>
    %cst_64 = arith.constant 1.600000e+01 : f32
    %129 = vector.broadcast %cst_64 : f32 to vector<32x1xf32>
    %130 = arith.divf %128, %129 : vector<32x1xf32>
    %131 = vector.broadcast %130 : vector<32x1xf32> to vector<32x16xf32>
    %132 = arith.subf %118, %131 : vector<32x16xf32>
    %133 = arith.mulf %132, %132 : vector<32x16xf32>
    %cst_65 = arith.constant dense<0.000000e+00> : vector<32xf32>
    %134 = vector.multi_reduction <add>, %133, %cst_65 [1] : vector<32x16xf32> to vector<32xf32>
    %135 = vector.shape_cast %134 : vector<32xf32> to vector<32x1xf32>
    %cst_66 = arith.constant 1.600000e+01 : f32
    %136 = vector.broadcast %cst_66 : f32 to vector<32x1xf32>
    %137 = arith.divf %135, %136 : vector<32x1xf32>
    %138 = vector.broadcast %130 : vector<32x1xf32> to vector<32x16xf32>
    %139 = arith.subf %118, %138 : vector<32x16xf32>
    %cst_67 = arith.constant 9.99999974E-6 : f32
    %140 = vector.broadcast %cst_67 : f32 to vector<32x1xf32>
    %141 = arith.addf %137, %140 : vector<32x1xf32>
    %142 = math.rsqrt %141 : vector<32x1xf32>
    %143 = vector.broadcast %142 : vector<32x1xf32> to vector<32x16xf32>
    %144 = arith.mulf %139, %143 : vector<32x16xf32>
    %145 = vector.broadcast %125 : vector<1x16xf32> to vector<32x16xf32>
    %146 = arith.mulf %144, %145 : vector<32x16xf32>
    %147 = vector.broadcast %126 : vector<1x16xf32> to vector<32x16xf32>
    %148 = arith.addf %146, %147 : vector<32x16xf32>
    %cst_68 = arith.constant dense<0.000000e+00> : vector<32x16xf32>
    %149 = tpu.matmul %148, %119, %cst_68 {dimension_numbers = #tpu.dot_dimension_numbers<[1], [0], [0], [1], [0, 0, 1, 1], [], []>} : vector<32x16xf32>, vector<16x16xf32>, vector<32x16xf32> -> vector<32x16xf32>
    %c540 = arith.constant 540 : index
    %c0_69 = arith.constant 0 : index
    %150 = vector.load %arg2[%c540, %c0_69] : memref<696x128xf32, #tpu.memory_space<vmem>>, vector<1x16xf32>
    %151 = vector.broadcast %150 : vector<1x16xf32> to vector<32x16xf32>
    %152 = arith.addf %149, %151 : vector<32x16xf32>
    %cst_70 = arith.constant dense<0.000000e+00> : vector<32x16xf32>
    %153 = tpu.matmul %148, %120, %cst_70 {dimension_numbers = #tpu.dot_dimension_numbers<[1], [0], [0], [1], [0, 0, 1, 1], [], []>} : vector<32x16xf32>, vector<16x16xf32>, vector<32x16xf32> -> vector<32x16xf32>
    %c541 = arith.constant 541 : index
    %c0_71 = arith.constant 0 : index
    %154 = vector.load %arg2[%c541, %c0_71] : memref<696x128xf32, #tpu.memory_space<vmem>>, vector<1x16xf32>
    %155 = vector.broadcast %154 : vector<1x16xf32> to vector<32x16xf32>
    %156 = arith.addf %153, %155 : vector<32x16xf32>
    %cst_72 = arith.constant dense<0.000000e+00> : vector<32x16xf32>
    %157 = tpu.matmul %148, %121, %cst_72 {dimension_numbers = #tpu.dot_dimension_numbers<[1], [0], [0], [1], [0, 0, 1, 1], [], []>} : vector<32x16xf32>, vector<16x16xf32>, vector<32x16xf32> -> vector<32x16xf32>
    %c542 = arith.constant 542 : index
    %c0_73 = arith.constant 0 : index
    %158 = vector.load %arg2[%c542, %c0_73] : memref<696x128xf32, #tpu.memory_space<vmem>>, vector<1x16xf32>
    %159 = vector.broadcast %158 : vector<1x16xf32> to vector<32x16xf32>
    %160 = arith.addf %157, %159 : vector<32x16xf32>
    %161 = tpu.concatenate %156, %156, %156, %156 in 0 : vector<32x16xf32>, vector<32x16xf32>, vector<32x16xf32>, vector<32x16xf32> -> vector<128x16xf32>
    %162 = arith.mulf %161, %12 : vector<128x16xf32>
    %163 = tpu.concatenate %160, %160, %160, %160 in 0 : vector<32x16xf32>, vector<32x16xf32>, vector<32x16xf32>, vector<32x16xf32> -> vector<128x16xf32>
    %164 = arith.mulf %163, %12 : vector<128x16xf32>
    %cst_74 = arith.constant dense<0.000000e+00> : vector<32x128xf32>
    %165 = tpu.matmul %152, %162, %cst_74 {dimension_numbers = #tpu.dot_dimension_numbers<[1], [1], [0], [0], [0, 0, 1, 0], [], []>} : vector<32x16xf32>, vector<128x16xf32>, vector<32x128xf32> -> vector<32x128xf32>
    %cst_75 = arith.constant 2.500000e-01 : f32
    %166 = vector.broadcast %cst_75 : f32 to vector<32x128xf32>
    %167 = arith.mulf %165, %166 : vector<32x128xf32>
    %168 = arith.addf %167, %11 : vector<32x128xf32>
    %cst_76 = arith.constant dense<0xFF800000> : vector<32xf32>
    %169 = vector.multi_reduction <maximumf>, %168, %cst_76 [1] : vector<32x128xf32> to vector<32xf32>
    %170 = vector.shape_cast %169 : vector<32xf32> to vector<32x1xf32>
    %171 = vector.broadcast %170 : vector<32x1xf32> to vector<32x128xf32>
    %172 = arith.subf %168, %171 : vector<32x128xf32>
    %173 = math.exp %172 : vector<32x128xf32>
    %cst_77 = arith.constant dense<0.000000e+00> : vector<32x128xf32>
    %174 = tpu.matmul %173, %13, %cst_77 {dimension_numbers = #tpu.dot_dimension_numbers<[1], [0], [0], [1], [0, 0, 1, 1], [], []>} : vector<32x128xf32>, vector<128x128xf32>, vector<32x128xf32> -> vector<32x128xf32>
    %175 = tpu.reciprocal %174 : vector<32x128xf32> -> vector<32x128xf32>
    %176 = arith.mulf %173, %175 : vector<32x128xf32>
    %cst_78 = arith.constant dense<0.000000e+00> : vector<32x16xf32>
    %177 = tpu.matmul %176, %164, %cst_78 {dimension_numbers = #tpu.dot_dimension_numbers<[1], [0], [0], [1], [0, 0, 1, 1], [], []>} : vector<32x128xf32>, vector<128x16xf32>, vector<32x16xf32> -> vector<32x16xf32>
    %cst_79 = arith.constant dense<0.000000e+00> : vector<32x16xf32>
    %178 = tpu.matmul %177, %122, %cst_79 {dimension_numbers = #tpu.dot_dimension_numbers<[1], [0], [0], [1], [0, 0, 1, 1], [], []>} : vector<32x16xf32>, vector<16x16xf32>, vector<32x16xf32> -> vector<32x16xf32>
    %179 = arith.addf %118, %178 : vector<32x16xf32>
    %c543 = arith.constant 543 : index
    %c0_80 = arith.constant 0 : index
    %180 = vector.load %arg2[%c543, %c0_80] : memref<696x128xf32, #tpu.memory_space<vmem>>, vector<1x16xf32>
    %181 = vector.broadcast %180 : vector<1x16xf32> to vector<32x16xf32>
    %182 = arith.addf %179, %181 : vector<32x16xf32>
    %c538 = arith.constant 538 : index
    %c0_81 = arith.constant 0 : index
    %183 = vector.load %arg2[%c538, %c0_81] : memref<696x128xf32, #tpu.memory_space<vmem>>, vector<1x16xf32>
    %c539 = arith.constant 539 : index
    %c0_82 = arith.constant 0 : index
    %184 = vector.load %arg2[%c539, %c0_82] : memref<696x128xf32, #tpu.memory_space<vmem>>, vector<1x16xf32>
    %cst_83 = arith.constant dense<0.000000e+00> : vector<32xf32>
    %185 = vector.multi_reduction <add>, %182, %cst_83 [1] : vector<32x16xf32> to vector<32xf32>
    %186 = vector.shape_cast %185 : vector<32xf32> to vector<32x1xf32>
    %cst_84 = arith.constant 1.600000e+01 : f32
    %187 = vector.broadcast %cst_84 : f32 to vector<32x1xf32>
    %188 = arith.divf %186, %187 : vector<32x1xf32>
    %189 = vector.broadcast %188 : vector<32x1xf32> to vector<32x16xf32>
    %190 = arith.subf %182, %189 : vector<32x16xf32>
    %191 = arith.mulf %190, %190 : vector<32x16xf32>
    %cst_85 = arith.constant dense<0.000000e+00> : vector<32xf32>
    %192 = vector.multi_reduction <add>, %191, %cst_85 [1] : vector<32x16xf32> to vector<32xf32>
    %193 = vector.shape_cast %192 : vector<32xf32> to vector<32x1xf32>
    %cst_86 = arith.constant 1.600000e+01 : f32
    %194 = vector.broadcast %cst_86 : f32 to vector<32x1xf32>
    %195 = arith.divf %193, %194 : vector<32x1xf32>
    %196 = vector.broadcast %188 : vector<32x1xf32> to vector<32x16xf32>
    %197 = arith.subf %182, %196 : vector<32x16xf32>
    %cst_87 = arith.constant 9.99999974E-6 : f32
    %198 = vector.broadcast %cst_87 : f32 to vector<32x1xf32>
    %199 = arith.addf %195, %198 : vector<32x1xf32>
    %200 = math.rsqrt %199 : vector<32x1xf32>
    %201 = vector.broadcast %200 : vector<32x1xf32> to vector<32x16xf32>
    %202 = arith.mulf %197, %201 : vector<32x16xf32>
    %203 = vector.broadcast %183 : vector<1x16xf32> to vector<32x16xf32>
    %204 = arith.mulf %202, %203 : vector<32x16xf32>
    %205 = vector.broadcast %184 : vector<1x16xf32> to vector<32x16xf32>
    %206 = arith.addf %204, %205 : vector<32x16xf32>
    %cst_88 = arith.constant dense<0.000000e+00> : vector<32x64xf32>
    %207 = tpu.matmul %206, %123, %cst_88 {dimension_numbers = #tpu.dot_dimension_numbers<[1], [0], [0], [1], [0, 0, 1, 1], [], []>} : vector<32x16xf32>, vector<16x64xf32>, vector<32x64xf32> -> vector<32x64xf32>
    %c544 = arith.constant 544 : index
    %c0_89 = arith.constant 0 : index
    %208 = vector.load %arg2[%c544, %c0_89] : memref<696x128xf32, #tpu.memory_space<vmem>>, vector<1x64xf32>
    %209 = vector.broadcast %208 : vector<1x64xf32> to vector<32x64xf32>
    %210 = arith.addf %207, %209 : vector<32x64xf32>
    %cst_90 = arith.constant 5.000000e-01 : f32
    %211 = vector.broadcast %cst_90 : f32 to vector<32x64xf32>
    %212 = arith.mulf %211, %210 : vector<32x64xf32>
    %cst_91 = arith.constant 0.707106769 : f32
    %213 = vector.broadcast %cst_91 : f32 to vector<32x64xf32>
    %214 = arith.mulf %210, %213 : vector<32x64xf32>
    %215 = math.erf %214 : vector<32x64xf32>
    %cst_92 = arith.constant 1.000000e+00 : f32
    %216 = vector.broadcast %cst_92 : f32 to vector<32x64xf32>
    %217 = arith.addf %216, %215 : vector<32x64xf32>
    %218 = arith.mulf %212, %217 : vector<32x64xf32>
    %cst_93 = arith.constant dense<0.000000e+00> : vector<32x16xf32>
    %219 = tpu.matmul %218, %124, %cst_93 {dimension_numbers = #tpu.dot_dimension_numbers<[1], [0], [0], [1], [0, 0, 1, 1], [], []>} : vector<32x64xf32>, vector<64x16xf32>, vector<32x16xf32> -> vector<32x16xf32>
    %c545 = arith.constant 545 : index
    %c0_94 = arith.constant 0 : index
    %220 = vector.load %arg2[%c545, %c0_94] : memref<696x128xf32, #tpu.memory_space<vmem>>, vector<1x16xf32>
    %221 = vector.broadcast %220 : vector<1x16xf32> to vector<32x16xf32>
    %222 = arith.addf %219, %221 : vector<32x16xf32>
    %223 = arith.addf %182, %222 : vector<32x16xf32>
    %c352 = arith.constant 352 : index
    %c0_95 = arith.constant 0 : index
    %224 = vector.load %arg2[%c352, %c0_95] : memref<696x128xf32, #tpu.memory_space<vmem>>, vector<16x3xf32>
    %cst_96 = arith.constant dense<0.000000e+00> : vector<32x3xf32>
    %225 = tpu.matmul %223, %224, %cst_96 {dimension_numbers = #tpu.dot_dimension_numbers<[1], [0], [0], [1], [0, 0, 1, 1], [], []>} : vector<32x16xf32>, vector<16x3xf32>, vector<32x3xf32> -> vector<32x3xf32>
    %c368 = arith.constant 368 : index
    %c0_97 = arith.constant 0 : index
    %226 = vector.load %arg2[%c368, %c0_97] : memref<696x128xf32, #tpu.memory_space<vmem>>, vector<1x3xf32>
    %227 = vector.broadcast %226 : vector<1x3xf32> to vector<32x3xf32>
    %228 = arith.addf %225, %227 : vector<32x3xf32>
    %c0_98 = arith.constant 0 : index
    %c0_99 = arith.constant 0 : index
    %229 = vector.load %arg3[%c0_98, %c0_99] : memref<32x3xf32, #tpu.memory_space<vmem>>, vector<32x3xf32>
    tpu.vector_store %arg3[%c0_98, %c0_99], %228 {strides = array<i32>} : memref<32x3xf32, #tpu.memory_space<vmem>>, vector<32x3xf32>,
    return
  }
}

</mosaic_0001>

<bundles_post_ra>
// kernel: tts_gan_generator_forward.1
= control target key start
LH: loop header
LB: loop body
LE: loop exit
PB: predicated region body
PF: predicated region fallthrough
CT: control target
= control target key end

     0   :  { %8 = vsyncpa [#allocation3], 0  ;;  %s4276_s0 = inlined_call_operand.hbm [shape: f32[2,32], index: 0, kind: input, shape index: {}]   ;;  %s4277_s1 = inlined_call_operand.hbm [shape: f32[80,256], index: 1, kind: input, shape index: {}]   ;;  %s4278_s2 = inlined_call_operand.hbm [shape: f32[696,128], index: 2, kind: input, shape index: {}]   ;;  %s4279_s3 = inlined_call_operand.vmem [shape: f32[32,3], index: 3, kind: output, shape index: {}]  }
   0x1   :  { %9 = vsyncpa [#allocation5], 0  ;;  %s3770_s12 = smov [#allocation4]  }
   0x2   :  { %s25_s13 = sshll.u32 %s3770_s12, 4  ;;  %s26_s13 = int_to_ptr.vmem [resolvable:$true] %s25_s13 }
   0x3   :  { %s3714_s14 = scalar_lea.vmem %s26_s13, 2560  ;;  %p3719_p1 = scmp.lt.s32.totalorder %s26_s13, %s26_s13 }
   0x4   :  { %p3715_p0 = scmp.ne.s32.totalorder %s26_s13, %s3714_s14  ;;  %p3720_p2 = scmp.lt.s32.totalorder %s3714_s14, %s3714_s14 }
   0x6   :  { %p3721_p3 = por %p3720_p2, %p3719_p1 }
   0x8   :  { %p3722_p4 = pnand %p3721_p3, %p3715_p0 }
   0xa   :  { %3725 = shalt.err (!%p3722_p4)
}
   0xb   :  { %s3771_s15 = smov 256   ;;  %s3772_s16 = smov 16  }
   0xc   :  { %31 = dma.hbm_to_vmem [thread:$0]  %s4277_s1, 2560, %s26_s13, [#allocation5], %s3771_s15, %s3771_s15, %s3772_s16  }
   0xd   :  { %s3773_s19 = smov [#allocation2]   ;;  %s3774_s21 = smov [#allocation6]  }
   0xe   :  { %s16_s20 = sshll.u32 %s3773_s19, 4  ;;  %s37_s22 = sshll.u32 %s3774_s21, 4  ;;  %s17_s20 = int_to_ptr.vmem [resolvable:$true] %s16_s20  ;;  %s38_s22 = int_to_ptr.vmem [resolvable:$true] %s37_s22 }
   0xf   :  { %s3734_s23 = scalar_lea.vmem %s17_s20, 32  ;;  %p3739_p6 = scmp.lt.s32.totalorder %s17_s20, %s17_s20 }
  0x10   :  { %p3735_p5 = scmp.ne.s32.totalorder %s17_s20, %s3734_s23  ;;  %p3740_p7 = scmp.lt.s32.totalorder %s3734_s23, %s3734_s23 }
  0x12   :  { %p3741_p8 = por %p3740_p7, %p3739_p6 }
  0x14   :  { %p3742_p9 = pnand %p3741_p8, %p3735_p5 }
  0x16   :  { %3745 = shalt.err (!%p3742_p9)
}
  0x17   :  { %19 = dma.hbm_to_vmem [thread:$0]  %s4276_s0, 32, %s17_s20, [#allocation3]  }
  0x18   :  { %s3754_s26 = scalar_lea.vmem %s38_s22, 11136  ;;  %p3759_p11 = scmp.lt.s32.totalorder %s38_s22, %s38_s22 }
  0x19   :  { %p3755_p10 = scmp.ne.s32.totalorder %s38_s22, %s3754_s26  ;;  %p3760_p12 = scmp.lt.s32.totalorder %s3754_s26, %s3754_s26 }
  0x1b   :  { %p3761_p13 = por %p3760_p12, %p3759_p11 }
  0x1d   :  { %p3762_p0 = pnand %p3761_p13, %p3755_p10 }
  0x1f   :  { %3765 = shalt.err (!%p3762_p0)
}
  0x20   :  { %s3775_s1 = smov 128   ;;  %s3776_s27 = smov 8  }
  0x21   :  { %43 = dma.hbm_to_vmem [thread:$0]  %s4278_s2, 11136, %s38_s22, [#allocation5], %s3775_s1, %s3775_s1, %s3776_s27  }
  0x22   :  { %3766 = dma.done.wait [#allocation3], 32  }
  0x23   :  { %3767 = vsyncadd [#allocation3], 4294967264 }
  0x24   :  { %3768 = dma.done.wait [#allocation5], 13696  }
  0x25   :  { %3769 = vsyncadd [#allocation5], 4294953600  ;;  %vm71_vm0 = vcmask 1041408   ;;  %vm58_vm1 = vcmask 15360   ;;  %v57_v0 = vld [vmem:[#allocation2] sm:$0x3] }
  0x26   :  { %v53_v1 = vld [vmem:[#allocation6] sm:$0xff]  ;;  %v54_v2 = vld [vmem:[#allocation6 + $0x8] sm:$0xff]  ;;  %3192 = vmatprep.subr.msk.mxu0 %vm71_vm0, %v57_v0  ;;  %v55_v3 = vld [vmem:[#allocation6 + $0x10] sm:$0xff]  ;;  %v3777_v13 = vmov 0.0   ;;  %vm168_vm2 = vcmask 261120   ;;  %vm435_vm3 = vcmask 130048  }
  0x27   :  { %3194 = vmatprep.mubr.msk.f32.mxu0 %vm58_vm1, %v53_v1  ;;  %v167_v4 = vld [vmem:[#allocation4 + $0x38] sm:$0xff]  ;;  %3193 = vmatpush3.msk.msra.mxu0 %vm71_vm0, %v57_v0  ;;  %v166_v5 = vld [vmem:[#allocation4 + $0x30] sm:$0xff]  ;;  %v165_v6 = vld [vmem:[#allocation4 + $0x28] sm:$0xff]  ;;  %vm1477_vm4 = vcmask 523264   ;;  %vm2844_vm5 = vcmask 23552  }
  0x28   :  { %205 = vmatprep.subr.mxu1 %v167_v4  ;;  %v164_v7 = vld [vmem:[#allocation4 + $0x20] sm:$0xff]  ;;  %3195 = vmatmul.mubr.msk.f32.vlgmr.msra.gmra.mxu0 %vm58_vm1, %v54_v2  ;;  %v163_v8 = vld [vmem:[#allocation4 + $0x18] sm:$0xff]  ;;  %v162_v10 = vld [vmem:[#allocation4 + $0x10] sm:$0xff] }
  0x29   :  { %206 = vmatpush1.msra.mxu1 %v166_v5  ;;  %3197 = vmatprep.mubr.msk.f32.mxu0 %vm58_vm1, %v55_v3  ;;  %v56_v9 = vld [vmem:[#allocation6 + $0x18] sm:$0xff]  ;;  %v161_v11 = vld [vmem:[#allocation4 + $0x8] sm:$0xff]  ;;  %v160_v12 = vld [vmem:[#allocation4] sm:$0xff] }
  0x2a   :  { %207 = vmatprep.subr.mxu1 %v165_v6  ;;  %245 = vmatprep.mubr.f32.mxu1 %v3777_v13  ;;  %v281_v14 = vld [vmem:[#allocation4 + $0x98] sm:$0xff]  ;;  %v280_v15 = vld [vmem:[#allocation4 + $0x90] sm:$0xff]  ;;  %v279_v20 = vld [vmem:[#allocation4 + $0x88] sm:$0xff] }
  0x2b   :  { %208 = vmatpush1.msra.mxu1 %v164_v7  ;;  %322 = vmatprep.subr.mxu0 %v281_v14  ;;  %v278_v21 = vld [vmem:[#allocation4 + $0x80] sm:$0xff]  ;;  %v271_v23 = vld [vmem:[#allocation4 + $0x48] sm:$0xff]  ;;  %v273_v29 = vld [vmem:[#allocation4 + $0x58] sm:$0xff] }
  0x2c   :  { %209 = vmatprep.subr.mxu1 %v163_v8  ;;  %3198 = vmatmul.mubr.msk.f32.gmra.mxu0 %vm58_vm1, %v56_v9  ;;  %v270_v24 = vld [vmem:[#allocation4 + $0x40] sm:$0xff]  ;;  %v272_v30 = vld [vmem:[#allocation4 + $0x50] sm:$0xff]  ;;  %v275_v35 = vld [vmem:[#allocation4 + $0x68] sm:$0xff] }
  0x2d   :  { %210 = vmatpush1.msra.mxu1 %v162_v10  ;;  %323 = vmatpush1.xpose.msra.mxu0 %v280_v15  ;;  %v274_v36 = vld [vmem:[#allocation4 + $0x60] sm:$0xff]  ;;  %v277_v41 = vld [vmem:[#allocation4 + $0x78] sm:$0xff]  ;;  %v276_v42 = vld [vmem:[#allocation4 + $0x70] sm:$0xff] }
  0x2e   :  { %211 = vmatprep.subr.mxu1 %v161_v11  ;;  %324 = vmatprep.subr.mxu0 %v279_v20  ;;  %v290_v46 = vld [vmem:[#allocation6 + $0x20] sm:$0xff]  ;;  %v291_v50 = vld [vmem:[#allocation6 + $0x28] sm:$0xff]  ;;  %v292_v55 = vld [vmem:[#allocation6 + $0x30] sm:$0xff] }
  0x2f   :  { %212 = vmatpush1.msra.mxu1 %v160_v12  ;;  %v293_v60 = vld [vmem:[#allocation6 + $0x38] sm:$0xff] }
  0x31   :  { %325 = vmatpush1.xpose.msra.mxu0 %v278_v21 }
  0xe8   :  { %v3196_v16 = vpop.f32.mrf.mxu0 }
  0xea   :  { %v141_v17 = vpop.f32.mrf.mxu0 }
  0xeb   :  { %2860 = vmatmul.mubr.msk.f32.vlgmr.msra.gmra.mxu1 %vm168_vm2, %v141_v17 }
  0xec   :  { %251 = vmatprep.mubr.f32.mxu1 %v3777_v13  ;;  %v3199_v18 = vpop.f32.mrf.mxu0 }
  0xee   :  { %v151_v19 = vpop.f32.mrf.mxu0 }
  0xef   :  { %2861 = vmatmul.mubr.msk.f32.gmra.mxu1 %vm168_vm2, %v3196_v16 }
  0xf0   :  { %257 = vmatprep.mubr.f32.mxu1 %v3777_v13 }
  0xf3   :  { %2862 = vmatmul.mubr.msk.f32.gmra.mxu1 %vm168_vm2, %v151_v19 }
  0xf4   :  { %263 = vmatprep.mubr.f32.mxu1 %v3777_v13 }
  0xf7   :  { %2863 = vmatmul.mubr.msk.f32.gmra.mxu1 %vm168_vm2, %v3199_v18 }
 0x1ab   :  { %v247_v22 = vpop.f32.mrf.mxu1 }
 0x1ac   :  { %v282_v27 = vmul.f32 %v270_v24, %v247_v22  ;;  %v416_v22 = vld [vmem:[#allocation6 + $0x190] sm:$0xff]  ;;  %v418_v24 = vld [vmem:[#allocation6 + $0x1a0] sm:$0xff] }
 0x1ad   :  { %v249_v25 = vpop.f32.mrf.mxu1  ;;  %3200 = vmatprep.subr.mxu0 %v416_v22  ;;  %3582 = vmatprep.subr.mxu1 %v416_v22 }
 0x1ae   :  { %v283_v26 = vmul.f32 %v271_v23, %v249_v25  ;;  %3584 = vmatpush3.msra.mxu1 %v416_v22  ;;  %v415_v23 = vld [vmem:[#allocation6 + $0x188] sm:$0xff]  ;;  %v420_v25 = vld [vmem:[#allocation6 + $0x1b0] sm:$0xff] }
 0x1af   :  { %v253_v28 = vpop.f32.mrf.mxu1  ;;  %3583 = vmatprep.subr.mxu1 %v415_v23 }
 0x1b0   :  { %358 = vmatprep.mubr.f32.mxu0 %v283_v26  ;;  %v284_v33 = vmul.f32 %v272_v30, %v253_v28  ;;  %3585 = vmatpush3.msra.mxu1 %v415_v23 }
 0x1b1   :  { %v255_v31 = vpop.f32.mrf.mxu1  ;;  %359 = vmatmul.mubr.f32.vlgmr.msra.gmra.mxu0 %v282_v27  ;;  %3220 = vmatprep.subr.mxu1 %v420_v25 }
 0x1b2   :  { %v285_v32 = vmul.f32 %v273_v29, %v255_v31  ;;  %3201 = vmatpush3.msra.mxu0 %v416_v22 }
 0x1b3   :  { %v259_v34 = vpop.f32.mrf.mxu1  ;;  %3202 = vmatprep.subr.mxu0 %v415_v23 }
 0x1b4   :  { %363 = vmatprep.mubr.f32.mxu0 %v285_v32  ;;  %v286_v39 = vmul.f32 %v274_v36, %v259_v34  ;;  %3203 = vmatpush3.msra.mxu0 %v415_v23 }
 0x1b5   :  { %v261_v37 = vpop.f32.mrf.mxu1  ;;  %364 = vmatmul.mubr.f32.gmra.mxu0 %v284_v33  ;;  %3210 = vmatprep.subr.mxu0 %v418_v24 }
 0x1b6   :  { %v287_v38 = vmul.f32 %v275_v35, %v261_v37 }
 0x1b7   :  { %v265_v40 = vpop.f32.mrf.mxu1 }
 0x1b8   :  { %368 = vmatprep.mubr.f32.mxu0 %v287_v38  ;;  %v288_v45 = vmul.f32 %v276_v42, %v265_v40 }
 0x1b9   :  { %v267_v43 = vpop.f32.mrf.mxu1  ;;  %369 = vmatmul.mubr.f32.gmra.mxu0 %v286_v39  ;;  %v2864_v39 = vld [vmem:[#allocation6 + $0x178] ss:$0 sm:$0xff] }
 0x1ba   :  { %v289_v44 = vmul.f32 %v277_v41, %v267_v43  ;;  %v2865_v41 = vld [vmem:[#allocation6 + $0x179] ss:$0 sm:$0xff] }
 0x1bc   :  { %373 = vmatprep.mubr.f32.mxu0 %v289_v44 }
 0x1bd   :  { %374 = vmatmul.mubr.f32.gmra.mxu0 %v288_v45 }
 0x271   :  { %v360_v47 = vpop.f32.mrf.mxu0 }
 0x272   :  { %v3811_v48 = vadd.f32 %v360_v47, %v290_v46 }
 0x273   :  { %v362_v49 = vpop.f32.mrf.mxu0 }
 0x274   :  { %v436_v51 = vsel %vm435_vm3, %v3811_v48, 0.0 }
 0x275   :  { %v365_v52 = vpop.f32.mrf.mxu0  ;;  %437 = vadd.xlane.f32.xlu0 %v436_v51  ;;  %v417_v51 = vld [vmem:[#allocation6 + $0x198] sm:$0xff] }
 0x276   :  { %v3815_v53 = vadd.f32 %v365_v52, %v291_v50 }
 0x277   :  { %v367_v54 = vpop.f32.mrf.mxu0 }
 0x278   :  { %v439_v56 = vsel %vm435_vm3, %v3815_v53, 0.0 }
 0x279   :  { %440 = vadd.xlane.f32.xlu0 %v439_v56  ;;  %v370_v57 = vpop.f32.mrf.mxu0 }
 0x27a   :  { %v3819_v58 = vadd.f32 %v370_v57, %v292_v55 }
 0x27b   :  { %v372_v59 = vpop.f32.mrf.mxu0 }
 0x27c   :  { %v442_v61 = vsel %vm435_vm3, %v3819_v58, 0.0 }
 0x27d   :  { %443 = vadd.xlane.f32.xlu1 %v442_v61  ;;  %v375_v62 = vpop.f32.mrf.mxu0  ;;  %v3844_v61 = vld [vmem:[#allocation6 + $0x158] sm:$0xff] }
 0x27e   :  { %v3823_v63 = vadd.f32 %v375_v62, %v293_v60  ;;  %v419_v60 = vld [vmem:[#allocation6 + $0x1a8] sm:$0xff]  ;;  %v413_v62 = vld [vmem:[#allocation6 + $0x150] sm:$0xff] }
 0x27f   :  { %v377_v0 = vpop.f32.mrf.mxu0 }
 0x280   :  { %v445_v1 = vsel %vm435_vm3, %v3823_v63, 0.0  ;;  %v412_v0 = vld [vmem:[#allocation6 + $0x148] sm:$0xff] }
 0x281   :  { %446 = vadd.xlane.f32.xlu1 %v445_v1  ;;  %v411_v1 = vld [vmem:[#allocation6 + $0x140] sm:$0xff] }
 0x2fe   :  { %v438_v2 = vpop.xlane.xlu0 %437 }
 0x2ff   :  { %v449_v3 = vmul.f32 0.0625, %v438_v2  ;;  %v410_v2 = vld [vmem:[#allocation6 + $0x138] sm:$0xff] }
 0x301   :  { %v453_v4 = vsub.f32 %v3811_v48, %v449_v3  ;;  %v409_v3 = vld [vmem:[#allocation6 + $0x130] sm:$0xff] }
 0x302   :  { %v441_v5 = vpop.xlane.xlu0 %440 }
 0x303   :  { %v450_v6 = vmul.f32 0.0625, %v441_v5  ;;  %v457_v7 = vmul.f32 %v453_v4, %v453_v4  ;;  %v407_v5 = vld [vmem:[#allocation6 + $0x120] sm:$0xff] }
 0x305   :  { %v454_v8 = vsub.f32 %v3815_v53, %v450_v6  ;;  %v461_v9 = vsel %vm435_vm3, %v457_v7, 0.0  ;;  %v406_v6 = vld [vmem:[#allocation6 + $0x118] sm:$0xff]  ;;  %v405_v7 = vld [vmem:[#allocation6 + $0x110] sm:$0xff] }
 0x306   :  { %462 = vadd.xlane.f32.xlu0 %v461_v9  ;;  %v444_v10 = vpop.xlane.xlu1 %443  ;;  %v403_v9 = vld [vmem:[#allocation6 + $0x100] sm:$0xff] }
 0x307   :  { %v451_v11 = vmul.f32 0.0625, %v444_v10  ;;  %v458_v12 = vmul.f32 %v454_v8, %v454_v8  ;;  %v402_v10 = vld [vmem:[#allocation6 + $0xf8] sm:$0xff] }
 0x309   :  { %v455_v13 = vsub.f32 %v3819_v58, %v451_v11  ;;  %v464_v14 = vsel %vm435_vm3, %v458_v12, 0.0  ;;  %v401_v11 = vld [vmem:[#allocation6 + $0xf0] sm:$0xff]  ;;  %v400_v12 = vld [vmem:[#allocation6 + $0xe8] sm:$0xff] }
 0x30a   :  { %465 = vadd.xlane.f32.xlu1 %v464_v14  ;;  %v447_v15 = vpop.xlane.xlu1 %446  ;;  %v2866_v14 = vld [vmem:[#allocation6 + $0x17c] ss:$0 sm:$0xff] }
 0x30b   :  { %v452_v16 = vmul.f32 0.0625, %v447_v15  ;;  %v459_v17 = vmul.f32 %v455_v13, %v455_v13 }
 0x30d   :  { %v456_v18 = vsub.f32 %v3823_v63, %v452_v16  ;;  %v467_v19 = vsel %vm435_vm3, %v459_v17, 0.0 }
 0x30e   :  { %468 = vadd.xlane.f32.xlu0 %v467_v19 }
 0x30f   :  { %v460_v20 = vmul.f32 %v456_v18, %v456_v18 }
 0x311   :  { %v470_v21 = vsel %vm435_vm3, %v460_v20, 0.0 }
 0x312   :  { %471 = vadd.xlane.f32.xlu1 %v470_v21  ;;  %v2871_v21 = vld [vmem:[#allocation6 + $0x17d] ss:$0 sm:$0xff] }
 0x38f   :  { %v463_v26 = vpop.xlane.xlu0 %462 }
 0x390   :  { %v473_v27 = vmul.f32 0.0625, %v463_v26 }
 0x392   :  { %v477_v28 = vadd.f32 1e-05, %v473_v27 }
 0x393   :  { %v466_v29 = vpop.xlane.xlu1 %465 }
 0x394   :  { %3594 = vrsqrt.f32 %v477_v28  ;;  %v474_v30 = vmul.f32 0.0625, %v466_v29  ;;  %v3858_v29 = vld [vmem:[#allocation6 + $0x17e] ss:$0 sm:$0xff] }
 0x396   :  { %v478_v31 = vadd.f32 1e-05, %v474_v30  ;;  %v3860_v30 = vld [vmem:[#allocation6 + $0xd0] sm:$0xff] }
 0x397   :  { %v469_v32 = vpop.xlane.xlu0 %468 }
 0x398   :  { %3596 = vrsqrt.f32 %v478_v31  ;;  %v475_v33 = vmul.f32 0.0625, %v469_v32 }
 0x39a   :  { %v479_v34 = vadd.f32 1e-05, %v475_v33 }
 0x39b   :  { %v472_v35 = vpop.xlane.xlu1 %471 }
 0x39c   :  { %3598 = vrsqrt.f32 %v479_v34  ;;  %v476_v36 = vmul.f32 0.0625, %v472_v35 }
 0x39e   :  { %v480_v37 = vadd.f32 1e-05, %v476_v36 }
 0x3a0   :  { %3600 = vrsqrt.f32 %v480_v37 }
 0x3a1   :  { %v3595_v38 = vpop.eup %3594 }
 0x3a2   :  { %v485_v40 = vmul.f32 %v3595_v38, %v453_v4  ;;  %v408_v4 = vld [vmem:[#allocation6 + $0x128] sm:$0xff] }
 0x3a4   :  { %v493_v42 = vmul.f32 %v2864_v39, %v485_v40 }
 0x3a5   :  { %v3597_v43 = vpop.eup %3596 }
 0x3a6   :  { %v486_v44 = vmul.f32 %v3597_v43, %v454_v8  ;;  %v501_v45 = vadd.f32 %v2865_v41, %v493_v42  ;;  %v404_v8 = vld [vmem:[#allocation6 + $0x108] sm:$0xff] }
 0x3a8   :  { %v494_v46 = vmul.f32 %v2864_v39, %v486_v44  ;;  %3204 = vmatprep.mubr.msk.f32.mxu0 %vm435_vm3, %v501_v45 }
 0x3a9   :  { %v3599_v47 = vpop.eup %3598 }
 0x3aa   :  { %v502_v49 = vadd.f32 %v2865_v41, %v494_v46  ;;  %v487_v50 = vmul.f32 %v3599_v47, %v455_v13  ;;  %v399_v13 = vld [vmem:[#allocation6 + $0xe0] sm:$0xff] }
 0x3ac   :  { %3205 = vmatmul.mubr.msk.f32.vlgmr.msra.gmra.mxu0 %vm435_vm3, %v502_v49  ;;  %v495_v52 = vmul.f32 %v2864_v39, %v487_v50 }
 0x3ad   :  { %v3601_v54 = vpop.eup %3600  ;;  %3211 = vmatpush3.msra.mxu0 %v418_v24  ;;  %3214 = vmatprep.mubr.msk.f32.mxu0 %vm435_vm3, %v501_v45  ;;  %v398_v24 = vld [vmem:[#allocation6 + $0xd8] sm:$0xff] }
 0x3ae   :  { %v488_v55 = vmul.f32 %v3601_v54, %v456_v18  ;;  %3212 = vmatprep.subr.mxu0 %v417_v51  ;;  %v503_v56 = vadd.f32 %v2865_v41, %v495_v52  ;;  %v3902_v54 = vld [vmem:[#allocation6 + $0xa8] sm:$0xff] }
 0x3af   :  { %3213 = vmatpush3.msra.mxu0 %v417_v51  ;;  %v3897_v51 = vld [vmem:[#allocation6 + $0xb0] sm:$0xff] }
 0x3b0   :  { %v496_v57 = vmul.f32 %v2864_v39, %v488_v55  ;;  %3207 = vmatprep.mubr.msk.f32.mxu1 %vm435_vm3, %v503_v56  ;;  %3215 = vmatmul.mubr.msk.f32.vlgmr.msra.gmra.mxu0 %vm435_vm3, %v502_v49  ;;  %v3871_v39 = vld [vmem:[#allocation6 + $0xc8] sm:$0xff] }
 0x3b1   :  { %3217 = vmatprep.mubr.msk.f32.mxu0 %vm435_vm3, %v503_v56 }
 0x3b2   :  { %v504_v59 = vadd.f32 %v2865_v41, %v496_v57 }
 0x3b4   :  { %3208 = vmatmul.mubr.msk.f32.vlgmr.msra.gmra.mxu1 %vm435_vm3, %v504_v59  ;;  %3218 = vmatmul.mubr.msk.f32.gmra.mxu0 %vm435_vm3, %v504_v59 }
 0x3b5   :  { %3221 = vmatpush3.msra.mxu1 %v420_v25  ;;  %3224 = vmatprep.mubr.msk.f32.mxu1 %vm435_vm3, %v501_v45  ;;  %v3882_v45 = vld [vmem:[#allocation6 + $0xc0] sm:$0xff] }
 0x3b6   :  { %3222 = vmatprep.subr.mxu1 %v419_v60 }
 0x3b7   :  { %3223 = vmatpush3.msra.mxu1 %v419_v60 }
 0x3b8   :  { %3225 = vmatmul.mubr.msk.f32.vlgmr.msra.gmra.mxu1 %vm435_vm3, %v502_v49  ;;  %3268 = vmatprep.subr.mxu1 %v3844_v61  ;;  %v3891_v49 = vld [vmem:[#allocation6 + $0xb8] sm:$0xff] }
 0x3b9   :  { %3227 = vmatprep.mubr.msk.f32.mxu1 %vm435_vm3, %v503_v56  ;;  %3269 = vmatpush3.msra.mxu1 %v3844_v61  ;;  %v3907_v56 = vld [vmem:[#allocation6 + $0xa0] sm:$0xff] }
 0x3ba   :  { %3270 = vmatprep.subr.mxu1 %v413_v62 }
 0x3bb   :  { %3271 = vmatpush3.msra.mxu1 %v413_v62  ;;  %v3918_v62 = vld [vmem:[#allocation6 + $0x90] sm:$0xff] }
 0x3bc   :  { %3228 = vmatmul.mubr.msk.f32.gmra.mxu1 %vm435_vm3, %v504_v59  ;;  %3272 = vmatprep.subr.mxu1 %v412_v0  ;;  %v3912_v59 = vld [vmem:[#allocation6 + $0x98] sm:$0xff] }
 0x3bd   :  { %3273 = vmatpush3.msra.mxu1 %v412_v0 }
 0x3be   :  { %3274 = vmatprep.subr.mxu1 %v411_v1 }
 0x3bf   :  { %3275 = vmatpush3.msra.mxu1 %v411_v1  ;;  %v3923_v1 = vld [vmem:[#allocation6 + $0x88] sm:$0xff] }
 0x3c0   :  { %3276 = vmatprep.subr.mxu1 %v410_v2 }
 0x3c1   :  { %3277 = vmatpush3.msra.mxu1 %v410_v2 }
 0x3c2   :  { %3278 = vmatprep.subr.mxu1 %v409_v3 }
 0x3c3   :  { %3279 = vmatpush3.msra.mxu1 %v409_v3  ;;  %v3928_v3 = vld [vmem:[#allocation6 + $0x80] sm:$0xff] }
 0x3c4   :  { %3280 = vmatprep.subr.mxu1 %v408_v4 }
 0x3c5   :  { %3281 = vmatpush3.msra.mxu1 %v408_v4 }
 0x3c6   :  { %3282 = vmatprep.subr.mxu1 %v407_v5 }
 0x3c7   :  { %3283 = vmatpush3.msra.mxu1 %v407_v5  ;;  %v3933_v5 = vld [vmem:[#allocation6 + $0x78] sm:$0xff] }
 0x3c8   :  { %3284 = vmatprep.subr.mxu1 %v406_v6 }
 0x3c9   :  { %3285 = vmatpush3.msra.mxu1 %v406_v6 }
 0x3ca   :  { %3286 = vmatprep.subr.mxu1 %v405_v7 }
 0x3cb   :  { %3287 = vmatpush3.msra.mxu1 %v405_v7  ;;  %v3939_v7 = vld [vmem:[#allocation6 + $0x70] sm:$0xff] }
 0x3cc   :  { %3288 = vmatprep.subr.mxu1 %v404_v8 }
 0x3cd   :  { %3289 = vmatpush3.msra.mxu1 %v404_v8 }
 0x3ce   :  { %3290 = vmatprep.subr.mxu1 %v403_v9 }
 0x3cf   :  { %3291 = vmatpush3.msra.mxu1 %v403_v9  ;;  %v3944_v9 = vld [vmem:[#allocation6 + $0x68] sm:$0xff] }
 0x3d0   :  { %3292 = vmatprep.subr.mxu1 %v402_v10 }
 0x3d1   :  { %3293 = vmatpush3.msra.mxu1 %v402_v10 }
 0x3d2   :  { %3294 = vmatprep.subr.mxu1 %v401_v11 }
 0x3d3   :  { %3295 = vmatpush3.msra.mxu1 %v401_v11  ;;  %v3949_v11 = vld [vmem:[#allocation6 + $0x60] sm:$0xff] }
 0x3d4   :  { %3296 = vmatprep.subr.mxu1 %v400_v12 }
 0x3d5   :  { %3297 = vmatpush3.msra.mxu1 %v400_v12 }
 0x3d6   :  { %3298 = vmatprep.subr.mxu1 %v399_v13 }
 0x3d7   :  { %3299 = vmatpush3.msra.mxu1 %v399_v13 }
 0x46c   :  { %v3206_v15 = vpop.f32.mrf.mxu0 }
 0x46d   :  { %v3851_v16 = vadd.f32 %v3206_v15, %v2866_v14 }
 0x46e   :  { %v588_v17 = vpop.f32.mrf.mxu0 }
 0x46f   :  { %v589_v18 = vadd.f32 %v2866_v14, %v588_v17 }
 0x470   :  { %v3216_v19 = vpop.f32.mrf.mxu0 }
 0x471   :  { %3262 = vmatprep.mubr.msk.f32.mxu0 %vm435_vm3, %v589_v18  ;;  %v684_v35 = vadd.f32 %v3216_v19, %v2871_v21  ;;  %v3964_v18 = vld [vmem:[#allocation6 + $0x40] sm:$0xff] }
 0x472   :  { %v678_v20 = vpop.f32.mrf.mxu0 }
 0x473   :  { %v679_v42 = vadd.f32 %v2871_v21, %v678_v20  ;;  %v800_v44 = vmul.f32 %v684_v35, %v3871_v39  ;;  %v796_v55 = vmul.f32 %v684_v35, %v3902_v54  ;;  %v792_v2 = vmul.f32 %v684_v35, %v3923_v1 }
 0x474   :  { %v3209_v22 = vpop.f32.mrf.mxu1  ;;  %v3219_v23 = vpop.f32.mrf.mxu0  ;;  %v788_v10 = vmul.f32 %v684_v35, %v3944_v9 }
 0x475   :  { %v3854_v25 = vadd.f32 %v3209_v22, %v2866_v14  ;;  %v3856_v26 = vadd.f32 %v3219_v23, %v2871_v21  ;;  %v799_v47 = vmul.f32 %v679_v42, %v3882_v45  ;;  %v795_v57 = vmul.f32 %v679_v42, %v3907_v56  ;;  %v3967_v22 = vld [vmem:[#allocation6 + $0x58] sm:$0xff] }
 0x476   :  { %v598_v27 = vpop.f32.mrf.mxu1  ;;  %v688_v28 = vpop.f32.mrf.mxu0  ;;  %v791_v4 = vmul.f32 %v679_v42, %v3928_v3  ;;  %v787_v12 = vmul.f32 %v679_v42, %v3949_v11 }
 0x477   :  { %v3862_v31 = vadd.f32 %v2866_v14, %v598_v27  ;;  %v689_v32 = vadd.f32 %v2871_v21, %v688_v28  ;;  %v802_v33 = vmul.f32 %v3856_v26, %v398_v24  ;;  %v798_v50 = vmul.f32 %v3856_v26, %v3891_v49  ;;  %v3962_v14 = vld [vmem:[#allocation6 + $0x48] sm:$0xff] }
 0x478   :  { %v3226_v34 = vpop.f32.mrf.mxu1  ;;  %v794_v60 = vmul.f32 %v3856_v26, %v3912_v59  ;;  %v790_v6 = vmul.f32 %v3856_v26, %v3933_v5  ;;  %v3970_v26 = vld [vmem:[#allocation6 + $0x50] sm:$0xff] }
 0x479   :  { %v3866_v36 = vadd.f32 %v3226_v34, %v3858_v29  ;;  %3230 = vmatprep.subr.msk.mxu0 %vm435_vm3, %v802_v33  ;;  %v801_v37 = vmul.f32 %v689_v32, %v3860_v30  ;;  %v797_v52 = vmul.f32 %v689_v32, %v3897_v51  ;;  %v793_v0 = vmul.f32 %v689_v32, %v3918_v62 }
 0x47a   :  { %v768_v38 = vpop.f32.mrf.mxu1  ;;  %3231 = vmatpush3.xpose.msk.msra.mxu0 %vm435_vm3, %v802_v33  ;;  %v789_v8 = vmul.f32 %v689_v32, %v3939_v7 }
 0x47b   :  { %v3874_v40 = vadd.f32 %v3858_v29, %v768_v38  ;;  %3232 = vmatprep.subr.msk.mxu0 %vm435_vm3, %v801_v37 }
 0x47c   :  { %v3229_v41 = vpop.f32.mrf.mxu1 }
 0x47d   :  { %v3878_v43 = vadd.f32 %v3229_v41, %v3858_v29 }
 0x47e   :  { %3233 = vmatpush3.xpose.msk.msra.mxu0 %vm435_vm3, %v801_v37 }
 0x47f   :  { %3234 = vmatprep.subr.msk.mxu0 %vm435_vm3, %v800_v44  ;;  %v3886_v46 = vmul.f32 %v3878_v43, %v398_v24 }
 0x481   :  { %3306 = vmatprep.subr.mxu1 %v3886_v46 }
 0x482   :  { %3235 = vmatpush3.xpose.msk.msra.mxu0 %vm435_vm3, %v800_v44 }
 0x483   :  { %3236 = vmatprep.subr.msk.mxu0 %vm435_vm3, %v799_v47 }
 0x486   :  { %3237 = vmatpush3.xpose.msk.msra.mxu0 %vm435_vm3, %v799_v47 }
 0x487   :  { %3238 = vmatprep.subr.msk.mxu0 %vm435_vm3, %v798_v50 }
 0x48a   :  { %3239 = vmatpush3.xpose.msk.msra.mxu0 %vm435_vm3, %v798_v50 }
 0x48b   :  { %3240 = vmatprep.subr.msk.mxu0 %vm435_vm3, %v797_v52 }
 0x48e   :  { %3241 = vmatpush3.xpose.msk.msra.mxu0 %vm435_vm3, %v797_v52  ;;  %v778_v52 = vpop.f32.mrf.mxu1 }
 0x48f   :  { %3242 = vmatprep.subr.msk.mxu0 %vm435_vm3, %v796_v55 }
 0x492   :  { %3243 = vmatpush3.xpose.msk.msra.mxu0 %vm435_vm3, %v796_v55  ;;  %v779_v55 = vadd.f32 %v3858_v29, %v778_v52  ;;  %v815_v29 = vmul.f32 %v3874_v40, %v3882_v45  ;;  %v810_v45 = vmul.f32 %v3878_v43, %v3912_v59 }
 0x493   :  { %3244 = vmatprep.subr.msk.mxu0 %vm435_vm3, %v795_v57 }
 0x496   :  { %3245 = vmatpush3.xpose.msk.msra.mxu0 %vm435_vm3, %v795_v57 }
 0x497   :  { %3246 = vmatprep.subr.msk.mxu0 %vm435_vm3, %v794_v60 }
 0x49a   :  { %3247 = vmatpush3.xpose.msk.msra.mxu0 %vm435_vm3, %v794_v60 }
 0x49b   :  { %3248 = vmatprep.subr.msk.mxu0 %vm435_vm3, %v793_v0 }
 0x49e   :  { %3249 = vmatpush3.xpose.msk.msra.mxu0 %vm435_vm3, %v793_v0  ;;  %v817_v0 = vmul.f32 %v779_v55, %v3860_v30  ;;  %v814_v30 = vmul.f32 %v3878_v43, %v3891_v49 }
 0x49f   :  { %3250 = vmatprep.subr.msk.mxu0 %vm435_vm3, %v792_v2 }
 0x4a2   :  { %3251 = vmatpush3.xpose.msk.msra.mxu0 %vm435_vm3, %v792_v2 }
 0x4a3   :  { %3252 = vmatprep.subr.msk.mxu0 %vm435_vm3, %v791_v4 }
 0x4a6   :  { %3253 = vmatpush3.xpose.msk.msra.mxu0 %vm435_vm3, %v791_v4  ;;  %v816_v4 = vmul.f32 %v3866_v36, %v3871_v39  ;;  %v813_v39 = vmul.f32 %v779_v55, %v3897_v51 }
 0x4a7   :  { %3254 = vmatprep.subr.msk.mxu0 %vm435_vm3, %v790_v6 }
 0x4aa   :  { %3255 = vmatpush3.xpose.msk.msra.mxu0 %vm435_vm3, %v790_v6 }
 0x4ab   :  { %3256 = vmatprep.subr.msk.mxu0 %vm435_vm3, %v789_v8 }
 0x4ae   :  { %3257 = vmatpush3.xpose.msk.msra.mxu0 %vm435_vm3, %v789_v8  ;;  %v811_v8 = vmul.f32 %v3874_v40, %v3907_v56 }
 0x4af   :  { %3258 = vmatprep.subr.msk.mxu0 %vm435_vm3, %v788_v10 }
 0x4b2   :  { %3259 = vmatpush3.xpose.msk.msra.mxu0 %vm435_vm3, %v788_v10  ;;  %v809_v10 = vmul.f32 %v779_v55, %v3918_v62 }
 0x4b3   :  { %3260 = vmatprep.subr.msk.mxu0 %vm435_vm3, %v787_v12 }
 0x4b6   :  { %3261 = vmatpush3.xpose.msk.msra.mxu0 %vm435_vm3, %v787_v12  ;;  %v808_v12 = vmul.f32 %v3866_v36, %v3923_v1 }
 0x4b9   :  { %3263 = vmatmul.mubr.msk.f32.vlgmr.msra.gmra.mxu0 %vm435_vm3, %v3851_v16 }
 0x4ba   :  { %3265 = vmatprep.mubr.msk.f32.mxu0 %vm435_vm3, %v3862_v31 }
 0x4bd   :  { %3266 = vmatmul.mubr.msk.f32.gmra.mxu0 %vm435_vm3, %v3854_v25 }
 0x579   :  { %v3264_v13 = vpop.f32.mrf.mxu0 }
 0x57a   :  { %v965_v15 = vmul.f32 0.25, %v3264_v13  ;;  %v807_v13 = vmul.f32 %v3874_v40, %v3928_v3 }
 0x57b   :  { %v945_v17 = vpop.f32.mrf.mxu0 }
 0x57c   :  { %v964_v19 = vmul.f32 0.25, %v945_v17  ;;  %v969_v20 = vadd.f32 %v965_v15, %v3962_v14  ;;  %v806_v15 = vmul.f32 %v3878_v43, %v3933_v5  ;;  %v805_v17 = vmul.f32 %v779_v55, %v3939_v7 }
 0x57d   :  { %v3267_v21 = vpop.f32.mrf.mxu0 }
 0x57e   :  { %v967_v16 = vmul.f32 0.25, %v3267_v21  ;;  %974 = vmax.xlane.f32.xlu1 %v969_v20  ;;  %v968_v23 = vadd.f32 %v964_v19, %v3964_v18  ;;  %v804_v19 = vmul.f32 %v3866_v36, %v3944_v9  ;;  %v422_v21 = vld [vmem:[#allocation6 + $0x1c0] sm:$0xff] }
 0x57f   :  { %v955_v24 = vpop.f32.mrf.mxu0  ;;  %3344 = vmatprep.subr.mxu0 %v422_v21 }
 0x580   :  { %v966_v25 = vmul.f32 0.25, %v955_v24  ;;  %972 = vmax.xlane.f32.xlu0 %v968_v23  ;;  %v971_v27 = vadd.f32 %v967_v16, %v3967_v22  ;;  %v421_v16 = vld [vmem:[#allocation6 + $0x1b8] sm:$0xff]  ;;  %3345 = vmatpush3.msra.mxu0 %v422_v21 }
 0x581   :  { %3346 = vmatprep.subr.mxu0 %v421_v16 }
 0x582   :  { %978 = vmax.xlane.f32.xlu1 %v971_v27  ;;  %v970_v28 = vadd.f32 %v966_v25, %v3970_v26  ;;  %3347 = vmatpush3.msra.mxu0 %v421_v16 }
 0x584   :  { %976 = vmax.xlane.f32.xlu0 %v970_v28 }
 0x607   :  { %v975_v31 = vpop.xlane.xlu1 %974 }
 0x608   :  { %v981_v32 = vsub.f32 %v969_v20, %v975_v31  ;;  %v803_v20 = vmul.f32 %v3874_v40, %v3949_v11 }
 0x609   :  { %v973_v33 = vpop.xlane.xlu0 %972 }
 0x60a   :  { %v980_v34 = vsub.f32 %v968_v23, %v973_v33  ;;  %v986_v35 = vmul.f32 1.442695, %v981_v32 }
 0x60b   :  { %v979_v37 = vpop.xlane.xlu1 %978 }
 0x60c   :  { %v984_v38 = vmul.f32 1.442695, %v980_v34  ;;  %v983_v41 = vsub.f32 %v971_v27, %v979_v37 }
 0x60d   :  { %v977_v42 = vpop.xlane.xlu0 %976 }
 0x60e   :  { %3602 = vpow2.f32 %v984_v38  ;;  %v982_v44 = vsub.f32 %v970_v28, %v977_v42  ;;  %v990_v47 = vmul.f32 1.442695, %v983_v41 }
 0x60f   :  { %3604 = vpow2.f32 %v986_v35 }
 0x610   :  { %v988_v50 = vmul.f32 1.442695, %v982_v44  ;;  %v2905_v44 = vld [vmem:[#allocation6 + $0x17f] ss:$0 sm:$0xff] }
 0x612   :  { %3606 = vpow2.f32 %v988_v50 }
 0x613   :  { %3608 = vpow2.f32 %v990_v47 }
 0x61b   :  { %v3975_v57 = vpop.eup %3602 }
 0x61c   :  { %v3977_v60 = vpop.eup %3604  ;;  %3300 = vmatprep.mubr.f32.mxu1 %v3975_v57 }
 0x61d   :  { %3301 = vmatmul.mubr.f32.vlgmr.msra.gmra.mxu1 %v3977_v60 }
 0x61e   :  { %3307 = vmatpush3.msra.mxu1 %v3886_v46  ;;  %v812_v46 = vmul.f32 %v3866_v36, %v3902_v54 }
 0x61f   :  { %v3983_v2 = vpop.eup %3606  ;;  %3308 = vmatprep.subr.mxu1 %v817_v0 }
 0x620   :  { %v3987_v6 = vpop.eup %3608  ;;  %3309 = vmatpush3.msra.mxu1 %v817_v0  ;;  %3303 = vmatprep.mubr.f32.mxu1 %v3983_v2 }
 0x621   :  { %3310 = vmatprep.subr.mxu1 %v816_v4  ;;  %3304 = vmatmul.mubr.f32.gmra.mxu1 %v3987_v6 }
 0x622   :  { %3311 = vmatpush3.msra.mxu1 %v816_v4 }
 0x623   :  { %3312 = vmatprep.subr.mxu1 %v815_v29 }
 0x624   :  { %3313 = vmatpush3.msra.mxu1 %v815_v29 }
 0x625   :  { %3314 = vmatprep.subr.mxu1 %v814_v30 }
 0x626   :  { %3315 = vmatpush3.msra.mxu1 %v814_v30 }
 0x627   :  { %3316 = vmatprep.subr.mxu1 %v813_v39 }
 0x628   :  { %3317 = vmatpush3.msra.mxu1 %v813_v39 }
 0x629   :  { %3318 = vmatprep.subr.mxu1 %v812_v46 }
 0x62a   :  { %3319 = vmatpush3.msra.mxu1 %v812_v46 }
 0x62b   :  { %3320 = vmatprep.subr.mxu1 %v811_v8 }
 0x62c   :  { %3321 = vmatpush3.msra.mxu1 %v811_v8 }
 0x62d   :  { %3322 = vmatprep.subr.mxu1 %v810_v45 }
 0x62e   :  { %3323 = vmatpush3.msra.mxu1 %v810_v45 }
 0x62f   :  { %3324 = vmatprep.subr.mxu1 %v809_v10 }
 0x630   :  { %3325 = vmatpush3.msra.mxu1 %v809_v10 }
 0x631   :  { %3326 = vmatprep.subr.mxu1 %v808_v12 }
 0x632   :  { %3327 = vmatpush3.msra.mxu1 %v808_v12 }
 0x633   :  { %3328 = vmatprep.subr.mxu1 %v807_v13 }
 0x634   :  { %3329 = vmatpush3.msra.mxu1 %v807_v13 }
 0x635   :  { %3330 = vmatprep.subr.mxu1 %v806_v15 }
 0x636   :  { %3331 = vmatpush3.msra.mxu1 %v806_v15 }
 0x637   :  { %3332 = vmatprep.subr.mxu1 %v805_v17 }
 0x638   :  { %3333 = vmatpush3.msra.mxu1 %v805_v17 }
 0x639   :  { %3334 = vmatprep.subr.mxu1 %v804_v19 }
 0x63a   :  { %3335 = vmatpush3.msra.mxu1 %v804_v19 }
 0x63b   :  { %3336 = vmatprep.subr.mxu1 %v803_v20 }
 0x63c   :  { %3337 = vmatpush3.msra.mxu1 %v803_v20 }
 0x6dd   :  { %v3302_v43 = vpop.f32.mrf.mxu1 }
 0x6de   :  { %3610 = vrcp.f32 %v3302_v43 }
 0x6df   :  { %v1058_v23 = vpop.f32.mrf.mxu1 }
 0x6e0   :  { %3612 = vrcp.f32 %v1058_v23 }
 0x6e1   :  { %v3305_v24 = vpop.f32.mrf.mxu1 }
 0x6e2   :  { %3614 = vrcp.f32 %v3305_v24 }
 0x6e3   :  { %v1068_v36 = vpop.f32.mrf.mxu1 }
 0x6e4   :  { %3616 = vrcp.f32 %v1068_v36 }
 0x6eb   :  { %v3611_v25 = vpop.eup %3610 }
 0x6ec   :  { %v1082_v28 = vmul.f32 %v3611_v25, %v3977_v60 }
 0x6ed   :  { %v3613_v27 = vpop.eup %3612 }
 0x6ee   :  { %v1081_v40 = vmul.f32 %v3613_v27, %v3975_v57 }
 0x6ef   :  { %v3615_v31 = vpop.eup %3614 }
 0x6f0   :  { %3338 = vmatprep.mubr.f32.mxu1 %v1081_v40  ;;  %v1084_v34 = vmul.f32 %v3615_v31, %v3987_v6  ;;  %v424_v40 = vld [vmem:[#allocation6 + $0x1d0] sm:$0xff] }
 0x6f1   :  { %v3617_v32 = vpop.eup %3616  ;;  %3339 = vmatmul.mubr.f32.vlgmr.msra.gmra.mxu1 %v1082_v28  ;;  %v423_v28 = vld [vmem:[#allocation6 + $0x1c8] sm:$0xff]  ;;  %3354 = vmatprep.subr.mxu1 %v424_v40 }
 0x6f2   :  { %v1083_v33 = vmul.f32 %v3617_v32, %v3983_v2  ;;  %3355 = vmatpush3.msra.mxu1 %v424_v40 }
 0x6f3   :  { %3356 = vmatprep.subr.mxu1 %v423_v28 }
 0x6f4   :  { %3341 = vmatprep.mubr.f32.mxu1 %v1083_v33  ;;  %3357 = vmatpush3.msra.mxu1 %v423_v28 }
 0x6f5   :  { %3342 = vmatmul.mubr.f32.gmra.mxu1 %v1084_v34 }
 0x7b1   :  { %v3340_v35 = vpop.f32.mrf.mxu1 }
 0x7b3   :  { %v1151_v37 = vpop.f32.mrf.mxu1 }
 0x7b4   :  { %3348 = vmatprep.mubr.msk.f32.mxu0 %vm435_vm3, %v1151_v37 }
 0x7b5   :  { %v3343_v38 = vpop.f32.mrf.mxu1  ;;  %3349 = vmatmul.mubr.msk.f32.vlgmr.msra.gmra.mxu0 %vm435_vm3, %v3340_v35 }
 0x7b7   :  { %v1161_v41 = vpop.f32.mrf.mxu1 }
 0x7b8   :  { %3351 = vmatprep.mubr.msk.f32.mxu0 %vm435_vm3, %v1161_v41 }
 0x7b9   :  { %3352 = vmatmul.mubr.msk.f32.gmra.mxu0 %vm435_vm3, %v3343_v38 }
 0x875   :  { %v3350_v42 = vpop.f32.mrf.mxu0 }
 0x876   :  { %v1268_v47 = vadd.f32 %v3350_v42, %v3815_v53 }
 0x877   :  { %v1248_v50 = vpop.f32.mrf.mxu0 }
 0x878   :  { %v4023_v52 = vadd.f32 %v2905_v44, %v1268_v47  ;;  %v1267_v55 = vadd.f32 %v1248_v50, %v3811_v48 }
 0x879   :  { %v3353_v57 = vpop.f32.mrf.mxu0 }
 0x87a   :  { %v4026_v60 = vadd.f32 %v2905_v44, %v1267_v55  ;;  %v1270_v0 = vadd.f32 %v3353_v57, %v3823_v63  ;;  %v1285_v2 = vsel %vm435_vm3, %v4023_v52, 0.0 }
 0x87b   :  { %1286 = vadd.xlane.f32.xlu1 %v1285_v2  ;;  %v1258_v4 = vpop.f32.mrf.mxu0 }
 0x87c   :  { %v4031_v6 = vadd.f32 %v2905_v44, %v1270_v0  ;;  %v1269_v29 = vadd.f32 %v1258_v4, %v3819_v58  ;;  %v1282_v53 = vsel %vm435_vm3, %v4026_v60, 0.0  ;;  %v2906_v0 = vld [vmem:[#allocation6 + $0x17a] ss:$0 sm:$0xff] }
 0x87d   :  { %1283 = vadd.xlane.f32.xlu0 %v1282_v53 }
 0x87e   :  { %v4036_v30 = vadd.f32 %v2905_v44, %v1269_v29  ;;  %v1291_v48 = vsel %vm435_vm3, %v4031_v6, 0.0 }
 0x87f   :  { %1292 = vadd.xlane.f32.xlu1 %v1291_v48  ;;  %v2907_v48 = vld [vmem:[#allocation6 + $0x17b] ss:$0 sm:$0xff] }
 0x880   :  { %v1288_v63 = vsel %vm435_vm3, %v4036_v30, 0.0 }
 0x881   :  { %1289 = vadd.xlane.f32.xlu0 %v1288_v63 }
 0x904   :  { %v1287_v39 = vpop.xlane.xlu1 %1286 }
 0x905   :  { %v1295_v46 = vmul.f32 0.0625, %v1287_v39 }
 0x906   :  { %v1284_v8 = vpop.xlane.xlu0 %1283 }
 0x907   :  { %v1299_v45 = vsub.f32 %v4023_v52, %v1295_v46  ;;  %v1294_v58 = vmul.f32 0.0625, %v1284_v8 }
 0x908   :  { %v1293_v10 = vpop.xlane.xlu1 %1292 }
 0x909   :  { %v1298_v12 = vsub.f32 %v4026_v60, %v1294_v58  ;;  %v1297_v13 = vmul.f32 0.0625, %v1293_v10  ;;  %v1303_v15 = vmul.f32 %v1299_v45, %v1299_v45 }
 0x90a   :  { %v1290_v17 = vpop.xlane.xlu0 %1289 }
 0x90b   :  { %v1301_v19 = vsub.f32 %v4031_v6, %v1297_v13  ;;  %v1296_v20 = vmul.f32 0.0625, %v1290_v17  ;;  %v1309_v21 = vsel %vm435_vm3, %v1303_v15, 0.0  ;;  %v1302_v16 = vmul.f32 %v1298_v12, %v1298_v12 }
 0x90c   :  { %1310 = vadd.xlane.f32.xlu1 %v1309_v21  ;;  %v429_v21 = vld [vmem:[#allocation6 + $0x1f8] sm:$0xff] }
 0x90d   :  { %v1300_v43 = vsub.f32 %v4036_v30, %v1296_v20  ;;  %v1306_v23 = vsel %vm435_vm3, %v1302_v16, 0.0  ;;  %v1305_v24 = vmul.f32 %v1301_v19, %v1301_v19  ;;  %v430_v20 = vld [vmem:[#allocation6 + $0x200] sm:$0xff]  ;;  %v428_v16 = vld [vmem:[#allocation6 + $0x1f0] sm:$0xff] }
 0x90e   :  { %1307 = vadd.xlane.f32.xlu0 %v1306_v23  ;;  %v426_v23 = vld [vmem:[#allocation6 + $0x1e0] sm:$0xff] }
 0x90f   :  { %v1315_v36 = vsel %vm435_vm3, %v1305_v24, 0.0  ;;  %v1304_v25 = vmul.f32 %v1300_v43, %v1300_v43  ;;  %v425_v24 = vld [vmem:[#allocation6 + $0x1d8] sm:$0xff] }
 0x910   :  { %1316 = vadd.xlane.f32.xlu1 %v1315_v36  ;;  %v2908_v36 = vld [vmem:[#allocation6 + $0x180] ss:$0 sm:$0xff] }
 0x911   :  { %v1312_v27 = vsel %vm435_vm3, %v1304_v25, 0.0 }
 0x912   :  { %1313 = vadd.xlane.f32.xlu0 %v1312_v27 }
 0x995   :  { %v1311_v31 = vpop.xlane.xlu1 %1310 }
 0x996   :  { %v1319_v32 = vmul.f32 0.0625, %v1311_v31 }
 0x997   :  { %v1308_v33 = vpop.xlane.xlu0 %1307 }
 0x998   :  { %v1323_v34 = vadd.f32 1e-05, %v1319_v32  ;;  %v1318_v35 = vmul.f32 0.0625, %v1308_v33 }
 0x999   :  { %v1317_v37 = vpop.xlane.xlu1 %1316 }
 0x99a   :  { %3618 = vrsqrt.f32 %v1323_v34  ;;  %v1322_v38 = vadd.f32 1e-05, %v1318_v35  ;;  %v1321_v41 = vmul.f32 0.0625, %v1317_v37 }
 0x99b   :  { %v1314_v42 = vpop.xlane.xlu0 %1313 }
 0x99c   :  { %3620 = vrsqrt.f32 %v1322_v38  ;;  %v1325_v44 = vadd.f32 1e-05, %v1321_v41  ;;  %v1320_v47 = vmul.f32 0.0625, %v1314_v42 }
 0x99e   :  { %3622 = vrsqrt.f32 %v1325_v44  ;;  %v1324_v50 = vadd.f32 1e-05, %v1320_v47 }
 0x9a0   :  { %3624 = vrsqrt.f32 %v1324_v50 }
 0x9a7   :  { %v3619_v55 = vpop.eup %3618 }
 0x9a8   :  { %v1331_v57 = vmul.f32 %v3619_v55, %v1299_v45 }
 0x9a9   :  { %v3621_v2 = vpop.eup %3620 }
 0x9aa   :  { %v1330_v4 = vmul.f32 %v3621_v2, %v1298_v12  ;;  %v1339_v53 = vmul.f32 %v2906_v0, %v1331_v57  ;;  %v432_v12 = vld [vmem:[#allocation6 + $0x210] sm:$0xff] }
 0x9ab   :  { %v3623_v29 = vpop.eup %3622  ;;  %3364 = vmatprep.subr.mxu0 %v432_v12 }
 0x9ac   :  { %v1338_v63 = vmul.f32 %v2906_v0, %v1330_v4  ;;  %v1333_v39 = vmul.f32 %v3623_v29, %v1301_v19  ;;  %v1347_v10 = vadd.f32 %v2907_v48, %v1339_v53  ;;  %3365 = vmatpush3.msra.mxu0 %v432_v12  ;;  %v431_v19 = vld [vmem:[#allocation6 + $0x208] sm:$0xff] }
 0x9ad   :  { %v3625_v46 = vpop.eup %3624  ;;  %3366 = vmatprep.subr.mxu0 %v431_v19 }
 0x9ae   :  { %v1346_v8 = vadd.f32 %v2907_v48, %v1338_v63  ;;  %v1332_v58 = vmul.f32 %v3625_v46, %v1300_v43  ;;  %v1341_v13 = vmul.f32 %v2906_v0, %v1333_v39  ;;  %3367 = vmatpush3.msra.mxu0 %v431_v19  ;;  %v427_v43 = vld [vmem:[#allocation6 + $0x1e8] sm:$0xff] }
 0x9af   :  { %3368 = vmatprep.subr.mxu0 %v430_v20 }
 0x9b0   :  { %3358 = vmatprep.mubr.msk.f32.mxu1 %vm435_vm3, %v1346_v8  ;;  %v1340_v15 = vmul.f32 %v2906_v0, %v1332_v58  ;;  %v1349_v45 = vadd.f32 %v2907_v48, %v1341_v13  ;;  %3369 = vmatpush3.msra.mxu0 %v430_v20  ;;  %v2913_v58 = vld [vmem:[#allocation6 + $0x181] ss:$0 sm:$0xff] }
 0x9b1   :  { %3359 = vmatmul.mubr.msk.f32.vlgmr.msra.gmra.mxu1 %vm435_vm3, %v1347_v10  ;;  %3370 = vmatprep.subr.mxu0 %v429_v21 }
 0x9b2   :  { %v1348_v17 = vadd.f32 %v2907_v48, %v1340_v15  ;;  %3371 = vmatpush3.msra.mxu0 %v429_v21 }
 0x9b3   :  { %3372 = vmatprep.subr.mxu0 %v428_v16 }
 0x9b4   :  { %3361 = vmatprep.mubr.msk.f32.mxu1 %vm435_vm3, %v1348_v17  ;;  %3373 = vmatpush3.msra.mxu0 %v428_v16 }
 0x9b5   :  { %3362 = vmatmul.mubr.msk.f32.gmra.mxu1 %vm435_vm3, %v1349_v45  ;;  %3374 = vmatprep.subr.mxu0 %v427_v43 }
 0x9b6   :  { %3375 = vmatpush3.msra.mxu0 %v427_v43 }
 0x9b7   :  { %3376 = vmatprep.subr.mxu0 %v426_v23 }
 0x9b8   :  { %3377 = vmatpush3.msra.mxu0 %v426_v23 }
 0x9b9   :  { %3378 = vmatprep.subr.mxu0 %v425_v24 }
 0x9ba   :  { %3379 = vmatpush3.msra.mxu0 %v425_v24 }
 0xa71   :  { %v3360_v25 = vpop.f32.mrf.mxu1 }
 0xa72   :  { %v1439_v27 = vadd.f32 %v3360_v25, %v2908_v36 }
 0xa73   :  { %v1433_v40 = vpop.f32.mrf.mxu1 }
 0xa74   :  { %v1457_v28 = vmul.f32 0.70710677, %v1439_v27  ;;  %v1434_v31 = vadd.f32 %v2908_v36, %v1433_v40  ;;  %v1453_v0 = vmul.f32 0.5, %v1439_v27 }
 0xa75   :  { %v3363_v32 = vpop.f32.mrf.mxu1 }
 0xa76   :  { %3626 = verf.f32 %v1457_v28  ;;  %v1456_v33 = vmul.f32 0.70710677, %v1434_v31  ;;  %v1449_v34 = vadd.f32 %v3363_v32, %v2908_v36  ;;  %v1452_v50 = vmul.f32 0.5, %v1434_v31 }
 0xa77   :  { %v1443_v35 = vpop.f32.mrf.mxu1 }
 0xa78   :  { %3628 = verf.f32 %v1456_v33  ;;  %v1459_v37 = vmul.f32 0.70710677, %v1449_v34  ;;  %v1444_v38 = vadd.f32 %v2908_v36, %v1443_v35  ;;  %v1455_v39 = vmul.f32 0.5, %v1449_v34 }
 0xa7a   :  { %3630 = verf.f32 %v1459_v37  ;;  %v1458_v41 = vmul.f32 0.70710677, %v1444_v38  ;;  %v1454_v48 = vmul.f32 0.5, %v1444_v38 }
 0xa7c   :  { %3632 = verf.f32 %v1458_v41 }
 0xa83   :  { %v3627_v42 = vpop.eup %3626 }
 0xa84   :  { %v1465_v47 = vadd.f32 1.0, %v3627_v42 }
 0xa85   :  { %v3629_v44 = vpop.eup %3628 }
 0xa86   :  { %v1464_v55 = vadd.f32 1.0, %v3629_v44  ;;  %v1469_v29 = vmul.f32 %v1465_v47, %v1453_v0  ;;  %v1580_v0 = vld [vmem:[#allocation6 + $0x230] sm:$0xff] }
 0xa87   :  { %v3631_v57 = vpop.eup %3630  ;;  %3386 = vmatprep.subr.mxu1 %v1580_v0 }
 0xa88   :  { %v1468_v2 = vmul.f32 %v1464_v55, %v1452_v50  ;;  %v1467_v53 = vadd.f32 1.0, %v3631_v57  ;;  %3387 = vmatpush3.msra.mxu1 %v1580_v0  ;;  %v3682_v0 = vld [vmem:[#allocation6 + $0x118] sm:$0xff] }
 0xa89   :  { %v3633_v4 = vpop.eup %3632 }
 0xa8a   :  { %v1466_v63 = vadd.f32 1.0, %v3633_v4  ;;  %3380 = vmatprep.mubr.msk.f32.mxu0 %vm1477_vm4, %v1468_v2  ;;  %v1471_v8 = vmul.f32 %v1467_v53, %v1455_v39  ;;  %v1579_v2 = vld [vmem:[#allocation6 + $0x228] sm:$0xff]  ;;  %v1584_v4 = vld [vmem:[#allocation6 + $0x250] sm:$0xff]  ;;  %v1582_v53 = vld [vmem:[#allocation6 + $0x240] sm:$0xff] }
 0xa8b   :  { %3381 = vmatmul.mubr.msk.f32.vlgmr.msra.gmra.mxu0 %vm1477_vm4, %v1469_v29  ;;  %3406 = vmatprep.subr.mxu0 %v1584_v4  ;;  %v1583_v29 = vld [vmem:[#allocation6 + $0x248] sm:$0xff] }
 0xa8c   :  { %v1470_v46 = vmul.f32 %v1466_v63, %v1454_v48  ;;  %3407 = vmatpush3.msra.mxu0 %v1584_v4  ;;  %3388 = vmatprep.subr.mxu1 %v1579_v2  ;;  %v3684_v4 = vld [vmem:[#allocation6 + $0x108] sm:$0xff] }
 0xa8d   :  { %3408 = vmatprep.subr.mxu0 %v1583_v29  ;;  %3389 = vmatpush3.msra.mxu1 %v1579_v2  ;;  %v3683_v2 = vld [vmem:[#allocation6 + $0x110] sm:$0xff] }
 0xa8e   :  { %3383 = vmatprep.mubr.msk.f32.mxu0 %vm1477_vm4, %v1470_v46  ;;  %3409 = vmatpush3.msra.mxu0 %v1583_v29  ;;  %v3685_v29 = vld [vmem:[#allocation6 + $0x100] sm:$0xff] }
 0xa8f   :  { %3384 = vmatmul.mubr.msk.f32.gmra.mxu0 %vm1477_vm4, %v1471_v8  ;;  %3454 = vmatprep.subr.mxu0 %v3844_v61 }
 0xa90   :  { %3396 = vmatprep.subr.mxu1 %v1582_v53 }
 0xb4b   :  { %v3382_v10 = vpop.f32.mrf.mxu0 }
 0xb4c   :  { %v1562_v13 = vadd.f32 %v3382_v10, %v2913_v58 }
 0xb4d   :  { %v1556_v15 = vpop.f32.mrf.mxu0 }
 0xb4e   :  { %v4059_v17 = vadd.f32 %v1562_v13, %v4023_v52  ;;  %v1557_v45 = vadd.f32 %v2913_v58, %v1556_v15 }
 0xb4f   :  { %v3385_v12 = vpop.f32.mrf.mxu0 }
 0xb50   :  { %v4062_v19 = vadd.f32 %v1557_v45, %v4026_v60  ;;  %v1572_v20 = vadd.f32 %v3385_v12, %v2913_v58  ;;  %v1602_v21 = vsel %vm435_vm3, %v4059_v17, 0.0 }
 0xb51   :  { %1603 = vadd.xlane.f32.xlu1 %v1602_v21  ;;  %v1566_v16 = vpop.f32.mrf.mxu0 }
 0xb52   :  { %v4067_v43 = vadd.f32 %v1572_v20, %v4031_v6  ;;  %v1567_v23 = vadd.f32 %v2913_v58, %v1566_v16  ;;  %v1599_v24 = vsel %vm435_vm3, %v4062_v19, 0.0  ;;  %v2918_v16 = vld [vmem:[#allocation6 + $0x218] ss:$0 sm:$0xff] }
 0xb53   :  { %1600 = vadd.xlane.f32.xlu0 %v1599_v24 }
 0xb54   :  { %v4072_v52 = vadd.f32 %v1567_v23, %v4036_v30  ;;  %v1608_v60 = vsel %vm435_vm3, %v4067_v43, 0.0 }
 0xb55   :  { %1609 = vadd.xlane.f32.xlu1 %v1608_v60 }
 0xb56   :  { %v1605_v36 = vsel %vm435_vm3, %v4072_v52, 0.0 }
 0xb57   :  { %1606 = vadd.xlane.f32.xlu0 %v1605_v36 }
 0xbda   :  { %v1604_v25 = vpop.xlane.xlu1 %1603 }
 0xbdb   :  { %v1612_v27 = vmul.f32 0.0625, %v1604_v25  ;;  %v2919_v25 = vld [vmem:[#allocation6 + $0x219] ss:$0 sm:$0xff] }
 0xbdc   :  { %v1601_v6 = vpop.xlane.xlu0 %1600 }
 0xbdd   :  { %v1616_v40 = vsub.f32 %v4059_v17, %v1612_v27  ;;  %v1611_v28 = vmul.f32 0.0625, %v1601_v6 }
 0xbde   :  { %v1610_v31 = vpop.xlane.xlu1 %1609 }
 0xbdf   :  { %v1615_v32 = vsub.f32 %v4062_v19, %v1611_v28  ;;  %v1614_v33 = vmul.f32 0.0625, %v1610_v31  ;;  %v1620_v30 = vmul.f32 %v1616_v40, %v1616_v40 }
 0xbe0   :  { %v1607_v34 = vpop.xlane.xlu0 %1606 }
 0xbe1   :  { %v1618_v35 = vsub.f32 %v4067_v43, %v1614_v33  ;;  %v1613_v37 = vmul.f32 0.0625, %v1607_v34  ;;  %v1626_v38 = vsel %vm435_vm3, %v1620_v30, 0.0  ;;  %v1619_v41 = vmul.f32 %v1615_v32, %v1615_v32 }
 0xbe2   :  { %1627 = vadd.xlane.f32.xlu1 %v1626_v38  ;;  %v1581_v38 = vld [vmem:[#allocation6 + $0x238] sm:$0xff] }
 0xbe3   :  { %v1617_v42 = vsub.f32 %v4072_v52, %v1613_v37  ;;  %v1623_v44 = vsel %vm435_vm3, %v1619_v41, 0.0  ;;  %v1622_v47 = vmul.f32 %v1618_v35, %v1618_v35  ;;  %v3675_v41 = vld [vmem:[#allocation6 + $0x150] sm:$0xff] }
 0xbe4   :  { %1624 = vadd.xlane.f32.xlu0 %v1623_v44  ;;  %v3677_v44 = vld [vmem:[#allocation6 + $0x140] sm:$0xff] }
 0xbe5   :  { %v1632_v50 = vsel %vm435_vm3, %v1622_v47, 0.0  ;;  %v1621_v55 = vmul.f32 %v1617_v42, %v1617_v42  ;;  %v3678_v47 = vld [vmem:[#allocation6 + $0x138] sm:$0xff] }
 0xbe6   :  { %1633 = vadd.xlane.f32.xlu1 %v1632_v50  ;;  %v3679_v50 = vld [vmem:[#allocation6 + $0x130] sm:$0xff] }
 0xbe7   :  { %v1629_v57 = vsel %vm435_vm3, %v1621_v55, 0.0  ;;  %v3680_v55 = vld [vmem:[#allocation6 + $0x128] sm:$0xff] }
 0xbe8   :  { %1630 = vadd.xlane.f32.xlu0 %v1629_v57  ;;  %v3681_v57 = vld [vmem:[#allocation6 + $0x120] sm:$0xff] }
 0xc6b   :  { %v1628_v48 = vpop.xlane.xlu1 %1627 }
 0xc6c   :  { %v1636_v63 = vmul.f32 0.0625, %v1628_v48  ;;  %v3687_v48 = vld [vmem:[#allocation6 + $0xf0] sm:$0xff] }
 0xc6d   :  { %v1625_v39 = vpop.xlane.xlu0 %1624 }
 0xc6e   :  { %v1640_v46 = vadd.f32 1e-05, %v1636_v63  ;;  %v1635_v8 = vmul.f32 0.0625, %v1625_v39  ;;  %v3688_v63 = vld [vmem:[#allocation6 + $0xe8] sm:$0xff]  ;;  %v3689_v39 = vld [vmem:[#allocation6 + $0xe0] sm:$0xff] }
 0xc6f   :  { %v1634_v58 = vpop.xlane.xlu1 %1633 }
 0xc70   :  { %3634 = vrsqrt.f32 %v1640_v46  ;;  %v1639_v10 = vadd.f32 1e-05, %v1635_v8  ;;  %v1638_v13 = vmul.f32 0.0625, %v1634_v58  ;;  %v2920_v46 = vld [vmem:[#allocation6 + $0x21c] ss:$0 sm:$0xff] }
 0xc71   :  { %v1631_v15 = vpop.xlane.xlu0 %1630  ;;  %v4099_v8 = vld [vmem:[#allocation6 + $0x21e] ss:$0 sm:$0xff] }
 0xc72   :  { %3636 = vrsqrt.f32 %v1639_v10  ;;  %v1642_v45 = vadd.f32 1e-05, %v1638_v13  ;;  %v1637_v12 = vmul.f32 0.0625, %v1631_v15 }
 0xc74   :  { %3638 = vrsqrt.f32 %v1642_v45  ;;  %v1641_v20 = vadd.f32 1e-05, %v1637_v12 }
 0xc76   :  { %3640 = vrsqrt.f32 %v1641_v20 }
 0xc7d   :  { %v3635_v21 = vpop.eup %3634 }
 0xc7e   :  { %v1648_v61 = vmul.f32 %v3635_v21, %v1616_v40 }
 0xc7f   :  { %v3637_v23 = vpop.eup %3636 }
 0xc80   :  { %v1647_v24 = vmul.f32 %v3637_v23, %v1615_v32  ;;  %v1656_v36 = vmul.f32 %v2918_v16, %v1648_v61  ;;  %v3674_v32 = vld [vmem:[#allocation6 + $0x158] sm:$0xff] }
 0xc81   :  { %v3639_v60 = vpop.eup %3638 }
 0xc82   :  { %v1655_v27 = vmul.f32 %v2918_v16, %v1647_v24  ;;  %v1650_v6 = vmul.f32 %v3639_v60, %v1618_v35  ;;  %v1664_v30 = vadd.f32 %v2919_v25, %v1656_v36 }
 0xc83   :  { %v3641_v28 = vpop.eup %3640 }
 0xc84   :  { %v1663_v31 = vadd.f32 %v2919_v25, %v1655_v27  ;;  %v1649_v33 = vmul.f32 %v3641_v28, %v1617_v42  ;;  %v1658_v34 = vmul.f32 %v2918_v16, %v1650_v6  ;;  %v3676_v42 = vld [vmem:[#allocation6 + $0x148] sm:$0xff] }
 0xc86   :  { %3390 = vmatprep.mubr.msk.f32.mxu1 %vm435_vm3, %v1663_v31  ;;  %3410 = vmatprep.mubr.msk.f32.mxu0 %vm435_vm3, %v1663_v31  ;;  %v1657_v37 = vmul.f32 %v2918_v16, %v1649_v33  ;;  %v1666_v35 = vadd.f32 %v2919_v25, %v1658_v34 }
 0xc87   :  { %3391 = vmatmul.mubr.msk.f32.vlgmr.msra.gmra.mxu1 %vm435_vm3, %v1664_v30  ;;  %3411 = vmatmul.mubr.msk.f32.vlgmr.msra.gmra.mxu0 %vm435_vm3, %v1664_v30 }
 0xc88   :  { %3397 = vmatpush3.msra.mxu1 %v1582_v53  ;;  %v1665_v40 = vadd.f32 %v2919_v25, %v1657_v37  ;;  %3455 = vmatpush3.msra.mxu0 %v3674_v32  ;;  %v3686_v53 = vld [vmem:[#allocation6 + $0xf8] sm:$0xff]  ;;  %v4122_v32 = vld [vmem:[#allocation6 + $0xd0] sm:$0xff] }
 0xc89   :  { %3398 = vmatprep.subr.mxu1 %v1581_v38  ;;  %3456 = vmatprep.subr.mxu0 %v3675_v41  ;;  %v3690_v25 = vld [vmem:[#allocation6 + $0xd8] sm:$0xff] }
 0xc8a   :  { %3393 = vmatprep.mubr.msk.f32.mxu1 %vm435_vm3, %v1665_v40  ;;  %3413 = vmatprep.mubr.msk.f32.mxu0 %vm435_vm3, %v1665_v40 }
 0xc8b   :  { %3394 = vmatmul.mubr.msk.f32.gmra.mxu1 %vm435_vm3, %v1666_v35  ;;  %3414 = vmatmul.mubr.msk.f32.gmra.mxu0 %vm435_vm3, %v1666_v35 }
 0xc8c   :  { %3399 = vmatpush3.msra.mxu1 %v1581_v38  ;;  %3400 = vmatprep.mubr.msk.f32.mxu1 %vm435_vm3, %v1663_v31  ;;  %v2925_v31 = vld [vmem:[#allocation6 + $0x21d] ss:$0 sm:$0xff] }
 0xc8d   :  { %3457 = vmatpush3.msra.mxu0 %v3675_v41 }
 0xc8e   :  { %3458 = vmatprep.subr.mxu0 %v3676_v42 }
 0xc8f   :  { %3401 = vmatmul.mubr.msk.f32.vlgmr.msra.gmra.mxu1 %vm435_vm3, %v1664_v30  ;;  %3459 = vmatpush3.msra.mxu0 %v3676_v42  ;;  %v4127_v42 = vld [vmem:[#allocation6 + $0xc8] sm:$0xff] }
 0xc90   :  { %3403 = vmatprep.mubr.msk.f32.mxu1 %vm435_vm3, %v1665_v40  ;;  %3460 = vmatprep.subr.mxu0 %v3677_v44 }
 0xc91   :  { %3461 = vmatpush3.msra.mxu0 %v3677_v44 }
 0xc92   :  { %3462 = vmatprep.subr.mxu0 %v3678_v47 }
 0xc93   :  { %3404 = vmatmul.mubr.msk.f32.gmra.mxu1 %vm435_vm3, %v1666_v35  ;;  %3463 = vmatpush3.msra.mxu0 %v3678_v47  ;;  %v4132_v47 = vld [vmem:[#allocation6 + $0xc0] sm:$0xff] }
 0xc94   :  { %3464 = vmatprep.subr.mxu0 %v3679_v50 }
 0xc95   :  { %3465 = vmatpush3.msra.mxu0 %v3679_v50 }
 0xc96   :  { %3466 = vmatprep.subr.mxu0 %v3680_v55 }
 0xc97   :  { %3467 = vmatpush3.msra.mxu0 %v3680_v55 }
 0xc98   :  { %3468 = vmatprep.subr.mxu0 %v3681_v57 }
 0xc99   :  { %3469 = vmatpush3.msra.mxu0 %v3681_v57 }
 0xc9a   :  { %3470 = vmatprep.subr.mxu0 %v3682_v0 }
 0xc9b   :  { %3471 = vmatpush3.msra.mxu0 %v3682_v0 }
 0xc9c   :  { %3472 = vmatprep.subr.mxu0 %v3683_v2 }
 0xc9d   :  { %3473 = vmatpush3.msra.mxu0 %v3683_v2 }
 0xc9e   :  { %3474 = vmatprep.subr.mxu0 %v3684_v4 }
 0xc9f   :  { %3475 = vmatpush3.msra.mxu0 %v3684_v4 }
 0xca0   :  { %3476 = vmatprep.subr.mxu0 %v3685_v29 }
 0xca1   :  { %3477 = vmatpush3.msra.mxu0 %v3685_v29 }
 0xca2   :  { %3478 = vmatprep.subr.mxu0 %v3686_v53 }
 0xca3   :  { %3479 = vmatpush3.msra.mxu0 %v3686_v53 }
 0xca4   :  { %3480 = vmatprep.subr.mxu0 %v3687_v48 }
 0xca5   :  { %3481 = vmatpush3.msra.mxu0 %v3687_v48 }
 0xca6   :  { %3482 = vmatprep.subr.mxu0 %v3688_v63 }
 0xca7   :  { %3483 = vmatpush3.msra.mxu0 %v3688_v63 }
 0xca8   :  { %3484 = vmatprep.subr.mxu0 %v3689_v39 }
 0xca9   :  { %3485 = vmatpush3.msra.mxu0 %v3689_v39 }
 0xd47   :  { %v3392_v58 = vpop.f32.mrf.mxu1  ;;  %v3412_v10 = vpop.f32.mrf.mxu0 }
 0xd48   :  { %v4101_v13 = vadd.f32 %v3392_v58, %v2920_v46  ;;  %v4104_v15 = vadd.f32 %v3412_v10, %v4099_v8 }
 0xd49   :  { %v1750_v45 = vpop.f32.mrf.mxu1  ;;  %v1930_v12 = vpop.f32.mrf.mxu0 }
 0xd4a   :  { %v1751_v20 = vadd.f32 %v2920_v46, %v1750_v45  ;;  %v4107_v21 = vadd.f32 %v4099_v8, %v1930_v12 }
 0xd4b   :  { %v3395_v61 = vpop.f32.mrf.mxu1  ;;  %v3415_v16 = vpop.f32.mrf.mxu0 }
 0xd4c   :  { %v4109_v23 = vadd.f32 %v3395_v61, %v2920_v46  ;;  %v4112_v24 = vadd.f32 %v3415_v16, %v4099_v8  ;;  %3448 = vmatprep.mubr.msk.f32.mxu1 %vm435_vm3, %v1751_v20 }
 0xd4d   :  { %v1760_v60 = vpop.f32.mrf.mxu1 }
 0xd4e   :  { %v4115_v36 = vadd.f32 %v2920_v46, %v1760_v60  ;;  %v4118_v27 = vmul.f32 %v3690_v25, %v4112_v24 }
 0xd4f   :  { %v3402_v6 = vpop.f32.mrf.mxu1 }
 0xd50   :  { %3492 = vmatprep.subr.mxu0 %v4118_v27  ;;  %v1846_v40 = vadd.f32 %v3402_v6, %v2925_v31 }
 0xd51   :  { %v1840_v28 = vpop.f32.mrf.mxu1 }
 0xd52   :  { %v1841_v41 = vadd.f32 %v2925_v31, %v1840_v28  ;;  %v1962_v44 = vmul.f32 %v4127_v42, %v1846_v40  ;;  %v1958_v0 = vmul.f32 %v1846_v40, %v3902_v54  ;;  %v1954_v54 = vmul.f32 %v1846_v40, %v3923_v1 }
 0xd53   :  { %v3405_v33 = vpop.f32.mrf.mxu1  ;;  %v1950_v1 = vmul.f32 %v1846_v40, %v3944_v9  ;;  %v3696_v40 = vld [vmem:[#allocation6 + $0xa8] sm:$0xff] }
 0xd54   :  { %v1856_v30 = vadd.f32 %v3405_v33, %v2925_v31  ;;  %v1961_v50 = vmul.f32 %v4132_v47, %v1841_v41  ;;  %v1957_v2 = vmul.f32 %v1841_v41, %v3907_v56  ;;  %v1953_v56 = vmul.f32 %v1841_v41, %v3928_v3 }
 0xd55   :  { %v1850_v34 = vpop.f32.mrf.mxu1  ;;  %v1949_v3 = vmul.f32 %v1841_v41, %v3949_v11  ;;  %v1978_v33 = vmul.f32 %v4127_v42, %v4104_v15  ;;  %v3698_v42 = vld [vmem:[#allocation6 + $0x98] sm:$0xff] }
 0xd56   :  { %v1851_v37 = vadd.f32 %v2925_v31, %v1850_v34  ;;  %v1964_v38 = vmul.f32 %v3690_v25, %v1856_v30  ;;  %v1960_v55 = vmul.f32 %v1856_v30, %v3891_v49  ;;  %v1956_v49 = vmul.f32 %v1856_v30, %v3912_v59 }
 0xd57   :  { %v1952_v59 = vmul.f32 %v1856_v30, %v3933_v5 }
 0xd58   :  { %3416 = vmatprep.subr.msk.mxu1 %vm435_vm3, %v1964_v38  ;;  %v1963_v35 = vmul.f32 %v4122_v32, %v1851_v37  ;;  %v1959_v57 = vmul.f32 %v1851_v37, %v3897_v51  ;;  %v1955_v51 = vmul.f32 %v1851_v37, %v3918_v62  ;;  %v1951_v62 = vmul.f32 %v1851_v37, %v3939_v7  ;;  %v3695_v37 = vld [vmem:[#allocation6 + $0xb0] sm:$0xff] }
 0xd59   :  { %3417 = vmatpush3.xpose.msk.msra.mxu1 %vm435_vm3, %v1964_v38 }
 0xd5a   :  { %3418 = vmatprep.subr.msk.mxu1 %vm435_vm3, %v1963_v35 }
 0xd5d   :  { %3419 = vmatpush3.xpose.msk.msra.mxu1 %vm435_vm3, %v1963_v35  ;;  %v3697_v35 = vld [vmem:[#allocation6 + $0xa0] sm:$0xff] }
 0xd5e   :  { %3420 = vmatprep.subr.msk.mxu1 %vm435_vm3, %v1962_v44  ;;  %v1973_v41 = vmul.f32 %v3697_v35, %v4107_v21 }
 0xd61   :  { %3421 = vmatpush3.xpose.msk.msra.mxu1 %vm435_vm3, %v1962_v44  ;;  %v1972_v44 = vmul.f32 %v3698_v42, %v4112_v24 }
 0xd62   :  { %3422 = vmatprep.subr.msk.mxu1 %vm435_vm3, %v1961_v50 }
 0xd65   :  { %3423 = vmatpush3.xpose.msk.msra.mxu1 %vm435_vm3, %v1961_v50 }
 0xd66   :  { %3424 = vmatprep.subr.msk.mxu1 %vm435_vm3, %v1960_v55 }
 0xd69   :  { %3425 = vmatpush3.xpose.msk.msra.mxu1 %vm435_vm3, %v1960_v55  ;;  %v3700_v55 = vld [vmem:[#allocation6 + $0x88] sm:$0xff] }
 0xd6a   :  { %3426 = vmatprep.subr.msk.mxu1 %vm435_vm3, %v1959_v57 }
 0xd6d   :  { %3427 = vmatpush3.xpose.msk.msra.mxu1 %vm435_vm3, %v1959_v57  ;;  %v1970_v57 = vmul.f32 %v3700_v55, %v4104_v15 }
 0xd6e   :  { %3428 = vmatprep.subr.msk.mxu1 %vm435_vm3, %v1958_v0 }
 0xd71   :  { %3429 = vmatpush3.xpose.msk.msra.mxu1 %vm435_vm3, %v1958_v0  ;;  %v3701_v0 = vld [vmem:[#allocation6 + $0x80] sm:$0xff] }
 0xd72   :  { %3430 = vmatprep.subr.msk.mxu1 %vm435_vm3, %v1957_v2 }
 0xd75   :  { %3431 = vmatpush3.xpose.msk.msra.mxu1 %vm435_vm3, %v1957_v2  ;;  %v1969_v2 = vmul.f32 %v3701_v0, %v4107_v21 }
 0xd76   :  { %3432 = vmatprep.subr.msk.mxu1 %vm435_vm3, %v1956_v49 }
 0xd79   :  { %3433 = vmatpush3.xpose.msk.msra.mxu1 %vm435_vm3, %v1956_v49  ;;  %v3702_v49 = vld [vmem:[#allocation6 + $0x78] sm:$0xff] }
 0xd7a   :  { %3434 = vmatprep.subr.msk.mxu1 %vm435_vm3, %v1955_v51 }
 0xd7d   :  { %3435 = vmatpush3.xpose.msk.msra.mxu1 %vm435_vm3, %v1955_v51  ;;  %v1968_v51 = vmul.f32 %v3702_v49, %v4112_v24  ;;  %v1587_v49 = vld [vmem:[#allocation6 + $0x268] sm:$0xff] }
 0xd7e   :  { %3436 = vmatprep.subr.msk.mxu1 %vm435_vm3, %v1954_v54 }
 0xd81   :  { %3437 = vmatpush3.xpose.msk.msra.mxu1 %vm435_vm3, %v1954_v54  ;;  %v3703_v54 = vld [vmem:[#allocation6 + $0x70] sm:$0xff] }
 0xd82   :  { %3438 = vmatprep.subr.msk.mxu1 %vm435_vm3, %v1953_v56 }
 0xd85   :  { %3439 = vmatpush3.xpose.msk.msra.mxu1 %vm435_vm3, %v1953_v56 }
 0xd86   :  { %3440 = vmatprep.subr.msk.mxu1 %vm435_vm3, %v1952_v59 }
 0xd89   :  { %3441 = vmatpush3.xpose.msk.msra.mxu1 %vm435_vm3, %v1952_v59  ;;  %v3704_v59 = vld [vmem:[#allocation6 + $0x68] sm:$0xff] }
 0xd8a   :  { %3442 = vmatprep.subr.msk.mxu1 %vm435_vm3, %v1951_v62 }
 0xd8d   :  { %3443 = vmatpush3.xpose.msk.msra.mxu1 %vm435_vm3, %v1951_v62  ;;  %v1966_v62 = vmul.f32 %v3704_v59, %v4104_v15 }
 0xd8e   :  { %3444 = vmatprep.subr.msk.mxu1 %vm435_vm3, %v1950_v1 }
 0xd91   :  { %3445 = vmatpush3.xpose.msk.msra.mxu1 %vm435_vm3, %v1950_v1  ;;  %v3705_v1 = vld [vmem:[#allocation6 + $0x60] sm:$0xff] }
 0xd92   :  { %3446 = vmatprep.subr.msk.mxu1 %vm435_vm3, %v1949_v3 }
 0xd95   :  { %3447 = vmatpush3.xpose.msk.msra.mxu1 %vm435_vm3, %v1949_v3  ;;  %v1965_v3 = vmul.f32 %v3705_v1, %v4107_v21 }
 0xd98   :  { %3449 = vmatmul.mubr.msk.f32.vlgmr.msra.gmra.mxu1 %vm435_vm3, %v4101_v13 }
 0xd99   :  { %3451 = vmatprep.mubr.msk.f32.mxu1 %vm435_vm3, %v4115_v36 }
 0xd9c   :  { %3452 = vmatmul.mubr.msk.f32.gmra.mxu1 %vm435_vm3, %v4109_v23 }
 0xe58   :  { %v3450_v5 = vpop.f32.mrf.mxu1 }
 0xe59   :  { %v2127_v7 = vmul.f32 0.25, %v3450_v5  ;;  %v1586_v5 = vld [vmem:[#allocation6 + $0x260] sm:$0xff] }
 0xe5a   :  { %v2107_v9 = vpop.f32.mrf.mxu1  ;;  %3530 = vmatprep.subr.mxu1 %v1586_v5 }
 0xe5b   :  { %v2126_v4 = vmul.f32 0.25, %v2107_v9  ;;  %v2131_v11 = vadd.f32 %v2127_v7, %v3962_v14  ;;  %v1585_v7 = vld [vmem:[#allocation6 + $0x258] sm:$0xff]  ;;  %3531 = vmatpush3.msra.mxu1 %v1586_v5 }
 0xe5c   :  { %v3453_v29 = vpop.f32.mrf.mxu1  ;;  %3532 = vmatprep.subr.mxu1 %v1585_v7 }
 0xe5d   :  { %v2129_v53 = vmul.f32 0.25, %v3453_v29  ;;  %2136 = vmax.xlane.f32.xlu1 %v2131_v11  ;;  %v2130_v48 = vadd.f32 %v2126_v4, %v3964_v18  ;;  %3533 = vmatpush3.msra.mxu1 %v1585_v7 }
 0xe5e   :  { %v2117_v63 = vpop.f32.mrf.mxu1 }
 0xe5f   :  { %v2128_v39 = vmul.f32 0.25, %v2117_v63  ;;  %2134 = vmax.xlane.f32.xlu0 %v2130_v48  ;;  %v2133_v46 = vadd.f32 %v2129_v53, %v3967_v22  ;;  %v1940_v22 = vpop.f32.mrf.mxu0 }
 0xe61   :  { %2140 = vmax.xlane.f32.xlu1 %v2133_v46  ;;  %v2132_v58 = vadd.f32 %v2128_v39, %v3970_v26  ;;  %v1941_v26 = vadd.f32 %v4099_v8, %v1940_v22  ;;  %v1977_v8 = vmul.f32 %v4132_v47, %v4107_v21  ;;  %v3699_v47 = vld [vmem:[#allocation6 + $0x90] sm:$0xff] }
 0xe63   :  { %2138 = vmax.xlane.f32.xlu0 %v2132_v58  ;;  %v1979_v28 = vmul.f32 %v4122_v32, %v1941_v26  ;;  %v1975_v38 = vmul.f32 %v3695_v37, %v1941_v26  ;;  %v1974_v32 = vmul.f32 %v3696_v40, %v4104_v15  ;;  %v1971_v50 = vmul.f32 %v3699_v47, %v1941_v26 }
 0xe64   :  { %v1967_v56 = vmul.f32 %v3703_v54, %v1941_v26 }
 0xee6   :  { %v2137_v10 = vpop.xlane.xlu1 %2136 }
 0xee7   :  { %v2143_v13 = vsub.f32 %v2131_v11, %v2137_v10 }
 0xee8   :  { %v2135_v45 = vpop.xlane.xlu0 %2134 }
 0xee9   :  { %v2142_v12 = vsub.f32 %v2130_v48, %v2135_v45  ;;  %v2148_v20 = vmul.f32 1.442695, %v2143_v13 }
 0xeea   :  { %v2141_v14 = vpop.xlane.xlu1 %2140 }
 0xeeb   :  { %v2146_v61 = vmul.f32 1.442695, %v2142_v12  ;;  %v2145_v16 = vsub.f32 %v2133_v46, %v2141_v14 }
 0xeec   :  { %v2139_v23 = vpop.xlane.xlu0 %2138 }
 0xeed   :  { %3642 = vpow2.f32 %v2146_v61  ;;  %v2144_v18 = vsub.f32 %v2132_v58, %v2139_v23  ;;  %v2152_v60 = vmul.f32 1.442695, %v2145_v16 }
 0xeee   :  { %3644 = vpow2.f32 %v2148_v20  ;;  %v2959_v20 = vld [vmem:[#allocation6 + $0x21f] ss:$0 sm:$0xff] }
 0xeef   :  { %v2150_v36 = vmul.f32 1.442695, %v2144_v18 }
 0xef1   :  { %3646 = vpow2.f32 %v2150_v36 }
 0xef2   :  { %3648 = vpow2.f32 %v2152_v60 }
 0xefa   :  { %v4185_v25 = vpop.eup %3642 }
 0xefb   :  { %v4187_v6 = vpop.eup %3644  ;;  %3486 = vmatprep.mubr.f32.mxu0 %v4185_v25 }
 0xefc   :  { %3487 = vmatmul.mubr.f32.vlgmr.msra.gmra.mxu0 %v4187_v6 }
 0xefd   :  { %3493 = vmatpush3.msra.mxu0 %v4118_v27  ;;  %v3694_v27 = vld [vmem:[#allocation6 + $0xb8] sm:$0xff] }
 0xefe   :  { %v4193_v31 = vpop.eup %3646  ;;  %3494 = vmatprep.subr.mxu0 %v1979_v28  ;;  %v1976_v34 = vmul.f32 %v3694_v27, %v4112_v24 }
 0xeff   :  { %v4197_v30 = vpop.eup %3648  ;;  %3495 = vmatpush3.msra.mxu0 %v1979_v28  ;;  %3489 = vmatprep.mubr.f32.mxu0 %v4193_v31 }
 0xf00   :  { %3496 = vmatprep.subr.mxu0 %v1978_v33  ;;  %3490 = vmatmul.mubr.f32.gmra.mxu0 %v4197_v30 }
 0xf01   :  { %3497 = vmatpush3.msra.mxu0 %v1978_v33 }
 0xf02   :  { %3498 = vmatprep.subr.mxu0 %v1977_v8 }
 0xf03   :  { %3499 = vmatpush3.msra.mxu0 %v1977_v8 }
 0xf04   :  { %3500 = vmatprep.subr.mxu0 %v1976_v34 }
 0xf05   :  { %3501 = vmatpush3.msra.mxu0 %v1976_v34 }
 0xf06   :  { %3502 = vmatprep.subr.mxu0 %v1975_v38 }
 0xf07   :  { %3503 = vmatpush3.msra.mxu0 %v1975_v38 }
 0xf08   :  { %3504 = vmatprep.subr.mxu0 %v1974_v32 }
 0xf09   :  { %3505 = vmatpush3.msra.mxu0 %v1974_v32 }
 0xf0a   :  { %3506 = vmatprep.subr.mxu0 %v1973_v41 }
 0xf0b   :  { %3507 = vmatpush3.msra.mxu0 %v1973_v41 }
 0xf0c   :  { %3508 = vmatprep.subr.mxu0 %v1972_v44 }
 0xf0d   :  { %3509 = vmatpush3.msra.mxu0 %v1972_v44 }
 0xf0e   :  { %3510 = vmatprep.subr.mxu0 %v1971_v50 }
 0xf0f   :  { %3511 = vmatpush3.msra.mxu0 %v1971_v50 }
 0xf10   :  { %3512 = vmatprep.subr.mxu0 %v1970_v57 }
 0xf11   :  { %3513 = vmatpush3.msra.mxu0 %v1970_v57 }
 0xf12   :  { %3514 = vmatprep.subr.mxu0 %v1969_v2 }
 0xf13   :  { %3515 = vmatpush3.msra.mxu0 %v1969_v2  ;;  %v1588_v2 = vld [vmem:[#allocation6 + $0x270] sm:$0xff] }
 0xf14   :  { %3516 = vmatprep.subr.mxu0 %v1968_v51 }
 0xf15   :  { %3517 = vmatpush3.msra.mxu0 %v1968_v51 }
 0xf16   :  { %3518 = vmatprep.subr.mxu0 %v1967_v56 }
 0xf17   :  { %3519 = vmatpush3.msra.mxu0 %v1967_v56 }
 0xf18   :  { %3520 = vmatprep.subr.mxu0 %v1966_v62 }
 0xf19   :  { %3521 = vmatpush3.msra.mxu0 %v1966_v62 }
 0xf1a   :  { %3522 = vmatprep.subr.mxu0 %v1965_v3 }
 0xf1b   :  { %3523 = vmatpush3.msra.mxu0 %v1965_v3 }
 0xf1c   :  { %3540 = vmatprep.subr.mxu0 %v1588_v2 }
 0xfbc   :  { %v3488_v24 = vpop.f32.mrf.mxu0 }
 0xfbd   :  { %3650 = vrcp.f32 %v3488_v24 }
 0xfbe   :  { %v2220_v9 = vpop.f32.mrf.mxu0 }
 0xfbf   :  { %3652 = vrcp.f32 %v2220_v9 }
 0xfc0   :  { %v3491_v4 = vpop.f32.mrf.mxu0 }
 0xfc1   :  { %3654 = vrcp.f32 %v3491_v4 }
 0xfc2   :  { %v2230_v15 = vpop.f32.mrf.mxu0 }
 0xfc3   :  { %3656 = vrcp.f32 %v2230_v15 }
 0xfca   :  { %v3651_v11 = vpop.eup %3650 }
 0xfcb   :  { %v2244_v53 = vmul.f32 %v3651_v11, %v4187_v6 }
 0xfcc   :  { %v3653_v29 = vpop.eup %3652 }
 0xfcd   :  { %v2243_v21 = vmul.f32 %v3653_v29, %v4185_v25  ;;  %v2960_v29 = vld [vmem:[#allocation6 + $0x21a] ss:$0 sm:$0xff] }
 0xfce   :  { %v3655_v48 = vpop.eup %3654 }
 0xfcf   :  { %3524 = vmatprep.mubr.f32.mxu0 %v2243_v21  ;;  %v2246_v46 = vmul.f32 %v3655_v48, %v4197_v30 }
 0xfd0   :  { %v3657_v63 = vpop.eup %3656  ;;  %3525 = vmatmul.mubr.f32.vlgmr.msra.gmra.mxu0 %v2244_v53 }
 0xfd1   :  { %v2245_v39 = vmul.f32 %v3657_v63, %v4193_v31  ;;  %3541 = vmatpush3.msra.mxu0 %v1588_v2 }
 0xfd2   :  { %3542 = vmatprep.subr.mxu0 %v1587_v49 }
 0xfd3   :  { %3527 = vmatprep.mubr.f32.mxu0 %v2245_v39  ;;  %3543 = vmatpush3.msra.mxu0 %v1587_v49  ;;  %v2961_v39 = vld [vmem:[#allocation6 + $0x21b] ss:$0 sm:$0xff] }
 0xfd4   :  { %3528 = vmatmul.mubr.f32.gmra.mxu0 %v2246_v46 }
0x1090   :  { %v3526_v58 = vpop.f32.mrf.mxu0 }
0x1092   :  { %v2313_v10 = vpop.f32.mrf.mxu0 }
0x1093   :  { %3534 = vmatprep.mubr.msk.f32.mxu1 %vm435_vm3, %v2313_v10 }
0x1094   :  { %v3529_v13 = vpop.f32.mrf.mxu0  ;;  %3535 = vmatmul.mubr.msk.f32.vlgmr.msra.gmra.mxu1 %vm435_vm3, %v3526_v58 }
0x1096   :  { %v2323_v45 = vpop.f32.mrf.mxu0 }
0x1097   :  { %3537 = vmatprep.mubr.msk.f32.mxu1 %vm435_vm3, %v2323_v45 }
0x1098   :  { %3538 = vmatmul.mubr.msk.f32.gmra.mxu1 %vm435_vm3, %v3529_v13 }
0x1154   :  { %v3536_v12 = vpop.f32.mrf.mxu1 }
0x1155   :  { %v2430_v14 = vadd.f32 %v3536_v12, %v4059_v17 }
0x1156   :  { %v2410_v61 = vpop.f32.mrf.mxu1 }
0x1157   :  { %v4221_v16 = vadd.f32 %v2959_v20, %v2430_v14  ;;  %v2429_v23 = vadd.f32 %v2410_v61, %v4062_v19 }
0x1158   :  { %v3539_v18 = vpop.f32.mrf.mxu1 }
0x1159   :  { %v4224_v60 = vadd.f32 %v2959_v20, %v2429_v23  ;;  %v2432_v36 = vadd.f32 %v3539_v18, %v4067_v43  ;;  %v2447_v22 = vsel %vm435_vm3, %v4221_v16, 0.0  ;;  %v1596_v18 = vld [vmem:[#allocation6 + $0x2b0] sm:$0xff] }
0x115a   :  { %2448 = vadd.xlane.f32.xlu1 %v2447_v22  ;;  %v2420_v26 = vpop.f32.mrf.mxu1  ;;  %3550 = vmatprep.subr.mxu1 %v1596_v18  ;;  %v1594_v22 = vld [vmem:[#allocation6 + $0x2a0] sm:$0xff] }
0x115b   :  { %v4229_v25 = vadd.f32 %v2959_v20, %v2432_v36  ;;  %v2431_v6 = vadd.f32 %v2420_v26, %v4072_v52  ;;  %v2444_v17 = vsel %vm435_vm3, %v4224_v60, 0.0  ;;  %3551 = vmatpush3.msra.mxu1 %v1596_v18  ;;  %v1595_v36 = vld [vmem:[#allocation6 + $0x2a8] sm:$0xff]  ;;  %v1593_v26 = vld [vmem:[#allocation6 + $0x298] sm:$0xff] }
0x115c   :  { %2445 = vadd.xlane.f32.xlu0 %v2444_v17  ;;  %3552 = vmatprep.subr.mxu1 %v1595_v36  ;;  %v1591_v17 = vld [vmem:[#allocation6 + $0x288] sm:$0xff] }
0x115d   :  { %v4234_v28 = vadd.f32 %v2959_v20, %v2431_v6  ;;  %v2453_v19 = vsel %vm435_vm3, %v4229_v25, 0.0  ;;  %3553 = vmatpush3.msra.mxu1 %v1595_v36  ;;  %v1592_v6 = vld [vmem:[#allocation6 + $0x290] sm:$0xff] }
0x115e   :  { %2454 = vadd.xlane.f32.xlu1 %v2453_v19  ;;  %3554 = vmatprep.subr.mxu1 %v1594_v22  ;;  %v1590_v19 = vld [vmem:[#allocation6 + $0x280] sm:$0xff] }
0x115f   :  { %v2450_v43 = vsel %vm435_vm3, %v4234_v28, 0.0  ;;  %3555 = vmatpush3.msra.mxu1 %v1594_v22 }
0x1160   :  { %2451 = vadd.xlane.f32.xlu0 %v2450_v43  ;;  %3556 = vmatprep.subr.mxu1 %v1593_v26  ;;  %v1589_v43 = vld [vmem:[#allocation6 + $0x278] sm:$0xff] }
0x1161   :  { %3557 = vmatpush3.msra.mxu1 %v1593_v26 }
0x1162   :  { %3558 = vmatprep.subr.mxu1 %v1592_v6 }
0x1163   :  { %3559 = vmatpush3.msra.mxu1 %v1592_v6 }
0x1164   :  { %3560 = vmatprep.subr.mxu1 %v1591_v17 }
0x1165   :  { %3561 = vmatpush3.msra.mxu1 %v1591_v17 }
0x1166   :  { %3562 = vmatprep.subr.mxu1 %v1590_v19 }
0x1167   :  { %3563 = vmatpush3.msra.mxu1 %v1590_v19 }
0x1168   :  { %3564 = vmatprep.subr.mxu1 %v1589_v43 }
0x1169   :  { %3565 = vmatpush3.msra.mxu1 %v1589_v43 }
0x11e3   :  { %v2449_v31 = vpop.xlane.xlu1 %2448 }
0x11e4   :  { %v2457_v33 = vmul.f32 0.0625, %v2449_v31  ;;  %v2741_v31 = vld [vmem:[#allocation6 + $0x168] sm:$0xff] }
0x11e5   :  { %v2446_v30 = vpop.xlane.xlu0 %2445  ;;  %3572 = vmatprep.subr.mxu0 %v2741_v31 }
0x11e6   :  { %v2461_v8 = vsub.f32 %v4221_v16, %v2457_v33  ;;  %v2456_v52 = vmul.f32 0.0625, %v2446_v30  ;;  %v2962_v33 = vld [vmem:[#allocation6 + $0x220] ss:$0 sm:$0xff] }
0x11e7   :  { %v2455_v27 = vpop.xlane.xlu1 %2454 }
0x11e8   :  { %v2460_v34 = vsub.f32 %v4224_v60, %v2456_v52  ;;  %v2459_v37 = vmul.f32 0.0625, %v2455_v27  ;;  %v2465_v38 = vmul.f32 %v2461_v8, %v2461_v8 }
0x11e9   :  { %v2452_v40 = vpop.xlane.xlu0 %2451 }
0x11ea   :  { %v2463_v32 = vsub.f32 %v4229_v25, %v2459_v37  ;;  %v2458_v35 = vmul.f32 0.0625, %v2452_v40  ;;  %v2471_v41 = vsel %vm435_vm3, %v2465_v38, 0.0  ;;  %v2464_v42 = vmul.f32 %v2460_v34, %v2460_v34 }
0x11eb   :  { %2472 = vadd.xlane.f32.xlu1 %v2471_v41 }
0x11ec   :  { %v2462_v44 = vsub.f32 %v4234_v28, %v2458_v35  ;;  %v2468_v47 = vsel %vm435_vm3, %v2464_v42, 0.0  ;;  %v2467_v50 = vmul.f32 %v2463_v32, %v2463_v32 }
0x11ed   :  { %2469 = vadd.xlane.f32.xlu0 %v2468_v47 }
0x11ee   :  { %v2477_v55 = vsel %vm435_vm3, %v2467_v50, 0.0  ;;  %v2466_v57 = vmul.f32 %v2462_v44, %v2462_v44 }
0x11ef   :  { %2478 = vadd.xlane.f32.xlu1 %v2477_v55 }
0x11f0   :  { %v2474_v0 = vsel %vm435_vm3, %v2466_v57, 0.0 }
0x11f1   :  { %2475 = vadd.xlane.f32.xlu0 %v2474_v0 }
0x1274   :  { %v2473_v51 = vpop.xlane.xlu1 %2472 }
0x1275   :  { %v2481_v54 = vmul.f32 0.0625, %v2473_v51 }
0x1276   :  { %v2470_v56 = vpop.xlane.xlu0 %2469 }
0x1277   :  { %v2485_v59 = vadd.f32 1e-05, %v2481_v54  ;;  %v2480_v62 = vmul.f32 0.0625, %v2470_v56 }
0x1278   :  { %v2479_v1 = vpop.xlane.xlu1 %2478 }
0x1279   :  { %3658 = vrsqrt.f32 %v2485_v59  ;;  %v2484_v3 = vadd.f32 1e-05, %v2480_v62  ;;  %v2483_v5 = vmul.f32 0.0625, %v2479_v1 }
0x127a   :  { %v2476_v7 = vpop.xlane.xlu0 %2475 }
0x127b   :  { %3660 = vrsqrt.f32 %v2484_v3  ;;  %v2487_v24 = vadd.f32 1e-05, %v2483_v5  ;;  %v2482_v9 = vmul.f32 0.0625, %v2476_v7  ;;  %v2740_v7 = vld [vmem:[#allocation6 + $0x160] sm:$0xff] }
0x127d   :  { %3662 = vrsqrt.f32 %v2487_v24  ;;  %v2486_v4 = vadd.f32 1e-05, %v2482_v9  ;;  %v2967_v24 = vld [vmem:[#allocation6 + $0x221] ss:$0 sm:$0xff] }
0x127f   :  { %3664 = vrsqrt.f32 %v2486_v4 }
0x1286   :  { %v3659_v15 = vpop.eup %3658 }
0x1287   :  { %v2493_v11 = vmul.f32 %v3659_v15, %v2461_v8 }
0x1288   :  { %v3661_v21 = vpop.eup %3660 }
0x1289   :  { %v2492_v53 = vmul.f32 %v3661_v21, %v2460_v34  ;;  %v2501_v63 = vmul.f32 %v2960_v29, %v2493_v11 }
0x128a   :  { %v3663_v48 = vpop.eup %3662 }
0x128b   :  { %v2500_v46 = vmul.f32 %v2960_v29, %v2492_v53  ;;  %v2495_v58 = vmul.f32 %v3663_v48, %v2463_v32  ;;  %v2509_v12 = vadd.f32 %v2961_v39, %v2501_v63 }
0x128c   :  { %v3665_v10 = vpop.eup %3664 }
0x128d   :  { %v2508_v13 = vadd.f32 %v2961_v39, %v2500_v46  ;;  %v2494_v45 = vmul.f32 %v3665_v10, %v2462_v44  ;;  %v2503_v20 = vmul.f32 %v2960_v29, %v2495_v58  ;;  %v2972_v10 = vld [vmem:[#allocation6 + $0x170] ss:$0 sm:$0xff] }
0x128f   :  { %3544 = vmatprep.mubr.msk.f32.mxu0 %vm435_vm3, %v2508_v13  ;;  %v2502_v14 = vmul.f32 %v2960_v29, %v2494_v45  ;;  %v2511_v23 = vadd.f32 %v2961_v39, %v2503_v20 }
0x1290   :  { %3545 = vmatmul.mubr.msk.f32.vlgmr.msra.gmra.mxu0 %vm435_vm3, %v2509_v12 }
0x1291   :  { %v2510_v61 = vadd.f32 %v2961_v39, %v2502_v14  ;;  %3573 = vmatpush3.msra.mxu0 %v2741_v31 }
0x1292   :  { %3574 = vmatprep.subr.mxu0 %v2740_v7 }
0x1293   :  { %3547 = vmatprep.mubr.msk.f32.mxu0 %vm435_vm3, %v2510_v61  ;;  %3575 = vmatpush3.msra.mxu0 %v2740_v7 }
0x1294   :  { %3548 = vmatmul.mubr.msk.f32.gmra.mxu0 %vm435_vm3, %v2511_v23 }
0x1350   :  { %v3546_v30 = vpop.f32.mrf.mxu0 }
0x1351   :  { %v2601_v8 = vadd.f32 %v3546_v30, %v2962_v33 }
0x1352   :  { %v2595_v52 = vpop.f32.mrf.mxu0 }
0x1353   :  { %v2619_v27 = vmul.f32 0.70710677, %v2601_v8  ;;  %v2596_v34 = vadd.f32 %v2962_v33, %v2595_v52  ;;  %v2615_v2 = vmul.f32 0.5, %v2601_v8 }
0x1354   :  { %v3549_v37 = vpop.f32.mrf.mxu0 }
0x1355   :  { %3666 = verf.f32 %v2619_v27  ;;  %v2618_v38 = vmul.f32 0.70710677, %v2596_v34  ;;  %v2611_v40 = vadd.f32 %v3549_v37, %v2962_v33  ;;  %v2614_v55 = vmul.f32 0.5, %v2596_v34 }
0x1356   :  { %v2605_v32 = vpop.f32.mrf.mxu0 }
0x1357   :  { %3668 = verf.f32 %v2618_v38  ;;  %v2621_v35 = vmul.f32 0.70710677, %v2611_v40  ;;  %v2606_v41 = vadd.f32 %v2962_v33, %v2605_v32  ;;  %v2617_v1 = vmul.f32 0.5, %v2611_v40 }
0x1359   :  { %3670 = verf.f32 %v2621_v35  ;;  %v2620_v42 = vmul.f32 0.70710677, %v2606_v41  ;;  %v2616_v59 = vmul.f32 0.5, %v2606_v41 }
0x135b   :  { %3672 = verf.f32 %v2620_v42 }
0x1362   :  { %v3667_v44 = vpop.eup %3666 }
0x1363   :  { %v2627_v50 = vadd.f32 1.0, %v3667_v44 }
0x1364   :  { %v3669_v47 = vpop.eup %3668 }
0x1365   :  { %v2626_v57 = vadd.f32 1.0, %v3669_v47  ;;  %v2631_v54 = vmul.f32 %v2627_v50, %v2615_v2 }
0x1366   :  { %v3671_v0 = vpop.eup %3670 }
0x1367   :  { %v2630_v49 = vmul.f32 %v2626_v57, %v2614_v55  ;;  %v2629_v56 = vadd.f32 1.0, %v3671_v0 }
0x1368   :  { %v3673_v51 = vpop.eup %3672 }
0x1369   :  { %v2628_v62 = vadd.f32 1.0, %v3673_v51  ;;  %3566 = vmatprep.mubr.msk.f32.mxu1 %vm1477_vm4, %v2630_v49  ;;  %v2633_v5 = vmul.f32 %v2629_v56, %v2617_v1 }
0x136a   :  { %3567 = vmatmul.mubr.msk.f32.vlgmr.msra.gmra.mxu1 %vm1477_vm4, %v2631_v54 }
0x136b   :  { %v2632_v3 = vmul.f32 %v2628_v62, %v2616_v59 }
0x136d   :  { %3569 = vmatprep.mubr.msk.f32.mxu1 %vm1477_vm4, %v2632_v3 }
0x136e   :  { %3570 = vmatmul.mubr.msk.f32.gmra.mxu1 %vm1477_vm4, %v2633_v5 }
0x142a   :  { %v3568_v9 = vpop.f32.mrf.mxu1 }
0x142b   :  { %v2723_v4 = vadd.f32 %v3568_v9, %v2967_v24 }
0x142c   :  { %v2717_v15 = vpop.f32.mrf.mxu1 }
0x142d   :  { %v2718_v11 = vadd.f32 %v2967_v24, %v2717_v15  ;;  %v2737_v53 = vadd.f32 %v2723_v4, %v4221_v16 }
0x142e   :  { %v3571_v29 = vpop.f32.mrf.mxu1 }
0x142f   :  { %v2736_v21 = vadd.f32 %v2718_v11, %v4224_v60  ;;  %v2733_v48 = vadd.f32 %v3571_v29, %v2967_v24 }
0x1430   :  { %v2727_v63 = vpop.f32.mrf.mxu1 }
0x1431   :  { %v2728_v39 = vadd.f32 %v2967_v24, %v2727_v63  ;;  %3576 = vmatprep.mubr.msk.f32.mxu0 %vm435_vm3, %v2736_v21  ;;  %v2739_v58 = vadd.f32 %v2733_v48, %v4229_v25 }
0x1432   :  { %3577 = vmatmul.mubr.msk.f32.vlgmr.msra.gmra.mxu0 %vm435_vm3, %v2737_v53 }
0x1433   :  { %v2738_v46 = vadd.f32 %v2728_v39, %v4234_v28 }
0x1435   :  { %3579 = vmatprep.mubr.msk.f32.mxu0 %vm435_vm3, %v2738_v46 }
0x1436   :  { %3580 = vmatmul.mubr.msk.f32.gmra.mxu0 %vm435_vm3, %v2739_v58 }
0x14f2   :  { %v3578_v13 = vpop.f32.mrf.mxu0 }
0x14f3   :  { %v2831_v60 = vadd.f32 %v3578_v13, %v2972_v10 }
0x14f4   :  { %v2825_v16 = vpop.f32.mrf.mxu0 }
0x14f5   :  { %2846 = vst.msk [vmem:[%s4279_s3 + $0x8] sm:$0xff] %vm2844_vm5, %v2831_v60  ;;  %v2826_v45 = vadd.f32 %v2972_v10, %v2825_v16 }
0x14f6   :  { %v3581_v12 = vpop.f32.mrf.mxu0 }
0x14f7   :  { %2845 = vst.msk [vmem:[%s4279_s3] sm:$0xff] %vm2844_vm5, %v2826_v45  ;;  %v2841_v25 = vadd.f32 %v3581_v12, %v2972_v10 }
0x14f8   :  { %v2835_v28 = vpop.f32.mrf.mxu0 }
0x14f9   :  { %2848 = vst.msk [vmem:[%s4279_s3 + $0x18] sm:$0xff] %vm2844_vm5, %v2841_v25  ;;  %v2836_v20 = vadd.f32 %v2972_v10, %v2835_v28 }
0x14fb   :  { %2847 = vst.msk [vmem:[%s4279_s3 + $0x10] sm:$0xff] %vm2844_vm5, %v2836_v20 }
0x14fc   :  { %2853 = vsyncpa [#allocation3], 1 }
0x14fd   :  { %2854 = vsyncpa [#allocation5], 1 }

</bundles_post_ra>
